<compile_context>
chip_gen: v5e
topology: v5e:2x2
jax: 0.10.0
libtpu: 0.0.40
codegen_flags: <defaults>
</compile_context>

<pallas_src>
import math

import jax
import jax.numpy as jnp
from jax import lax
from jax.experimental import pallas as pl
from jax.experimental.pallas import tpu as pltpu

D_MODEL = 32
N_HEADS = 4
D_K = D_MODEL // N_HEADS
D_FF = 64
EPS = 1e-6
ALPHA = 1.0   # LayerNorm.alpha init (torch.ones(1))
GAMMA = 0.0   # LayerNorm.gamma init (torch.zeros(1))
NEG_INF = -1.0e9


def _layer_norm(v, d):
  """LayerNorm matching the reference: unbiased std (ddof=1), /(std+eps).

  Collapsed to one EUP rsqrt (eps placement differs negligibly from std+eps).
  """
  mean = jnp.mean(v, axis=-1, keepdims=True)
  diff = v - mean
  var = jnp.sum(diff * diff, axis=-1, keepdims=True) * (1.0 / (d - 1))
  return ALPHA * diff * lax.rsqrt(var + EPS) + GAMMA


def encoder_block_kernel(x_ref, bias_ref, wqkv_ref, bqkv_ref, wow2_ref,
                         wff1_ref, bmisc_ref, out_ref):
  BT, S, D = x_ref.shape
  R = BT * S
  H, DK = N_HEADS, D_K
  Z = H * BT                                   # heads folded into the batch axis

  # (BT,S,D) -> (R,D): S == 8 == f32 sublane tile, so this is layout-trivial.
  x = x_ref[...].reshape(R, D)

  # Packed small biases (f32): row0 = [bo | 0], row1 = b1, row2 = [b2 | 0].
  b_all = bmisc_ref[...]                       # (3, D_FF)
  bo = b_all[0:1, 0:D]
  b1 = b_all[1:2, :]
  b2 = b_all[2:3, 0:D]

  # ---- residual connection 1: x + SelfAttention(LayerNorm(x)) ----
  xn = _layer_norm(x, D)

  # Fused q|k|v projection: ONE lane-dense bf16 MXU push, f32 accumulation.
  # Columns: [q (D) | k (D) | v (D) | zero pad (D)]; inside each D-block head h
  # owns lanes h*DK:(h+1)*DK.  1/sqrt(d_k) is pre-folded into the q columns.
  qkv = jnp.dot(xn.astype(jnp.bfloat16), wqkv_ref[...],
                preferred_element_type=jnp.float32) + bqkv_ref[...]   # (R, 4D) f32
  qkv = qkv.astype(jnp.bfloat16)

  def heads_to_batch(base):
    # Gather per-head 8-lane column views into the batch axis:
    # (R, 4D) -> (H*BT, S, DK), head-major along axis 0 (z = h*BT + b).
    cols = [qkv[:, base + h * DK: base + (h + 1) * DK] for h in range(H)]
    return jnp.concatenate(cols, axis=0).reshape(Z, S, DK)

  q = heads_to_batch(0)
  k = heads_to_batch(D)
  v = heads_to_batch(2 * D)

  # Additive mask bias (0 = keep, -1e9 = masked), replicated once per head
  # along the folded (head, batch) axis.
  bias_z = jnp.concatenate([bias_ref[...]] * H, axis=0)          # (Z, 1, S) f32

  # Whole-head attention: two batched einsums + ONE softmax chain.
  scores = jnp.einsum("zqd,zkd->zqk", q, k,
                      preferred_element_type=jnp.float32) + bias_z   # (Z, S, S)
  m = jnp.max(scores, axis=-1, keepdims=True)
  e = jnp.exp(scores - m)
  probs = e * pl.reciprocal(jnp.sum(e, axis=-1, keepdims=True), approx=True)

  ctx = jnp.einsum("zqk,zkd->zqd", probs.astype(jnp.bfloat16), v,
                   preferred_element_type=jnp.float32)               # (Z, S, DK)

  # Put heads back on the lane axis: (Z,S,DK) -> (H,R,DK) -> (R, D).
  ctx = ctx.reshape(H, R, DK)
  ctx = jnp.concatenate([ctx[h] for h in range(H)], axis=-1)         # (R, D)

  # ONE output projection with w_o (rows 0:D of the packed [w_o; w_2] matrix).
  attn = jnp.dot(ctx.astype(jnp.bfloat16), wow2_ref[0:D, :],
                 preferred_element_type=jnp.float32) + bo
  x1 = x + attn

  # ---- residual connection 2: x1 + FeedForward(LayerNorm(x1)) ----
  x1n = _layer_norm(x1, D)
  h1 = jnp.maximum(
      jnp.dot(x1n.astype(jnp.bfloat16), wff1_ref[...],
              preferred_element_type=jnp.float32) + b1, 0.0)
  ff = jnp.dot(h1.astype(jnp.bfloat16), wow2_ref[D:, :],
               preferred_element_type=jnp.float32) + b2

  out_ref[...] = (x1 + ff).reshape(BT, S, D)


def _pack_params(params):
  """Repack nn.Linear-style params into the kernel's fused operand layout."""
  scale = 1.0 / math.sqrt(D_K)

  # Fused q|k|v projection weight, zero-padded to 128 lanes (lane-dense MXU
  # output).  The attention scale is folded into the q columns/bias (free).
  w_qkv = jnp.concatenate([params["wq"] * scale, params["wk"], params["wv"]],
                          axis=1)                                  # (D, 3D)
  w_qkv = jnp.pad(w_qkv, ((0, 0), (0, D_MODEL)))                   # (D, 4D)
  b_qkv = jnp.concatenate([params["bq"] * scale, params["bk"], params["bv"]],
                          axis=1)                                  # (1, 3D)
  b_qkv = jnp.pad(b_qkv, ((0, 0), (0, D_MODEL)))                   # (1, 4D)

  w_ow2 = jnp.concatenate([params["wo"], params["w2"]], axis=0)    # (D+D_FF, D)

  def pad_ff(b):                 # pad (1, D) biases to (1, D_FF)
    return jnp.pad(b, ((0, 0), (0, D_FF - b.shape[1])))

  b_misc = jnp.concatenate([pad_ff(params["bo"]), params["b1"],
                            pad_ff(params["b2"])], axis=0)         # (3, D_FF)

  # Matmul operands in bf16 (MXU-native on v6e/v7x, full rate on v5e);
  # biases stay f32 (VPU adds on the f32 accumulators).
  return (w_qkv.astype(jnp.bfloat16), b_qkv,
          w_ow2.astype(jnp.bfloat16), params["w1"].astype(jnp.bfloat16),
          b_misc)


def encoder_block(x, mask, params, *, b_tile=None, core_parallel=False):
  """x: (B, S, D) f32; mask: (B, 1, S) f32 (1 = keep, 0 = mask)."""
  B, S, D = x.shape
  assert D == D_MODEL
  if b_tile is None:
    # Single grid step by default: v5e/v6e have one TensorCore, and at this
    # size an extra grid step is pure per-step overhead even on v7x.
    b_tile = B
  assert B % b_tile == 0, "b_tile must divide the batch"
  n_steps = B // b_tile

  # Additive attention bias computed once outside the kernel.
  mask_bias = (mask - 1.0) * (-NEG_INF)       # 0 where keep, -1e9 where masked

  mats = _pack_params(params)                 # (w_qkv, b_qkv, w_ow2, w_ff1, b_misc)
  weight_specs = [pl.BlockSpec(m.shape, lambda i: (0, 0)) for m in mats]

  if n_steps == 1:
    dim_sem = ("arbitrary",)
  else:
    # Only CORE_PARALLEL actually shards a grid axis across v7x's two
    # TensorCores; plain "parallel" is kept for single-TC chips.
    dim_sem = (pltpu.CORE_PARALLEL if core_parallel else "parallel",)

  grid_spec = pltpu.PrefetchScalarGridSpec(
      num_scalar_prefetch=0,
      grid=(n_steps,),
      in_specs=[pl.BlockSpec((b_tile, S, D), lambda i: (i, 0, 0)),
                pl.BlockSpec((b_tile, 1, S), lambda i: (i, 0, 0))] + weight_specs,
      out_specs=pl.BlockSpec((b_tile, S, D), lambda i: (i, 0, 0)),
  )
  return pl.pallas_call(
      encoder_block_kernel,
      out_shape=jax.ShapeDtypeStruct((B, S, D), jnp.float32),
      grid_spec=grid_spec,
      compiler_params=pltpu.CompilerParams(dimension_semantics=dim_sem),
  )(x, mask_bias, *mats)


def init_params(key, d_model, d_ff):
  """Deterministic nn.Linear-style init; weights stored as (in, out)."""
  ks = jax.random.split(key, 12)

  def linear(kw, kb, fan_in, fan_out):
    bound = 1.0 / math.sqrt(fan_in)
    w = jax.random.uniform(kw, (fan_in, fan_out), jnp.float32, -bound, bound)
    b = jax.random.uniform(kb, (1, fan_out), jnp.float32, -bound, bound)
    return w, b

  wq, bq = linear(ks[0], ks[1], d_model, d_model)
  wk, bk = linear(ks[2], ks[3], d_model, d_model)
  wv, bv = linear(ks[4], ks[5], d_model, d_model)
  wo, bo = linear(ks[6], ks[7], d_model, d_model)
  w1, b1 = linear(ks[8], ks[9], d_model, d_ff)
  w2, b2 = linear(ks[10], ks[11], d_ff, d_model)
  return dict(wq=wq, bq=bq, wk=wk, bk=bk, wv=wv, bv=bv, wo=wo, bo=bo,
              w1=w1, b1=b1, w2=w2, b2=b2)


def reference(x, mask, params):
  """Pure-JAX f32 mirror of the PyTorch EncoderBlock forward (eval mode)."""
  B, S, D = x.shape
  d_k = D // N_HEADS

  def ln(v):
    mean = jnp.mean(v, axis=-1, keepdims=True)
    diff = v - mean
    std = jnp.sqrt(jnp.sum(diff * diff, axis=-1, keepdims=True) / (D - 1))
    return ALPHA * diff / (std + EPS) + GAMMA

  xn = ln(x)
  q = xn @ params["wq"] + params["bq"]
  k = xn @ params["wk"] + params["bk"]
  v = xn @ params["wv"] + params["bv"]
  q = q.reshape(B, S, N_HEADS, d_k).transpose(0, 2, 1, 3)
  k = k.reshape(B, S, N_HEADS, d_k).transpose(0, 2, 1, 3)
  v = v.reshape(B, S, N_HEADS, d_k).transpose(0, 2, 1, 3)
  scores = jnp.einsum("bhqd,bhkd->bhqk", q, k) / math.sqrt(d_k)
  scores = jnp.where(mask[:, None, :, :] == 0.0, NEG_INF, scores)
  probs = jax.nn.softmax(scores, axis=-1)
  a = jnp.einsum("bhqk,bhkd->bhqd", probs, v)
  a = a.transpose(0, 2, 1, 3).reshape(B, S, D)
  x1 = x + (a @ params["wo"] + params["bo"])
  x1n = ln(x1)
  ff = jnp.maximum(x1n @ params["w1"] + params["b1"], 0.0) @ params["w2"] + params["b2"]
  return x1 + ff


if __name__ == "__main__":
  B, S = 4, 8
  key = jax.random.PRNGKey(0)
  kx, kp = jax.random.split(key)

  x = jax.random.normal(kx, (B, S, D_MODEL), dtype=jnp.float32)
  # PyTorch-style padding mask (B, 1, 1, S): last 2 positions masked out.
  src_mask = jnp.concatenate(
      [jnp.ones((B, 1, 1, S - 2), jnp.float32),
       jnp.zeros((B, 1, 1, 2), jnp.float32)], axis=-1)
  mask_kernel = src_mask.reshape(B, 1, S)     # glue reshape for the kernel

  params = init_params(kp, D_MODEL, D_FF)

  out = encoder_block(x, mask_kernel, params)
  out = jax.block_until_ready(out)

  ref = reference(x, mask_kernel, params)
  max_err = float(jnp.max(jnp.abs(out - ref)))
  assert out.shape == (B, S, D_MODEL)
  # bf16 MXU operands (per perf review) + approx reciprocal: ~1e-2-scale abs
  # error vs the pure-f32 reference is expected; 3e-2 keeps a safety margin.
  assert max_err < 3e-2, f"mismatch vs reference, max abs err {max_err}"
  print("KERNEL_OK")
</pallas_src>

<mosaic_0001>
module attributes {stable_mosaic.version = 11 : i64} {
  func.func @encoder_block_kernel(%arg0: i32, %arg1: memref<4x8x32xf32, #tpu.memory_space<vmem>>, %arg2: memref<4x1x8xf32, #tpu.memory_space<vmem>>, %arg3: memref<32x128xbf16, #tpu.memory_space<vmem>>, %arg4: memref<1x128xf32, #tpu.memory_space<vmem>>, %arg5: memref<96x32xbf16, #tpu.memory_space<vmem>>, %arg6: memref<32x64xbf16, #tpu.memory_space<vmem>>, %arg7: memref<3x64xf32, #tpu.memory_space<vmem>>, %arg8: memref<4x8x32xf32, #tpu.memory_space<vmem>>) attributes {dimension_semantics = [#tpu.dimension_semantics<arbitrary>], iteration_bounds = array<i64: 1>, scalar_prefetch = 0 : i64, scratch_operands = 0 : i64, tpu.core_type = #tpu.core_type<tc>, window_params = [{transform_indices = @transform_0, window_bounds = array<i64: 4, 8, 32>}, {transform_indices = @transform_1, window_bounds = array<i64: 4, 1, 8>}, {pipeline_mode = #tpu.pipeline_mode<synchronous>, transform_indices = @transform_2, window_bounds = array<i64: 32, 128>}, {pipeline_mode = #tpu.pipeline_mode<synchronous>, transform_indices = @transform_3, window_bounds = array<i64: 1, 128>}, {pipeline_mode = #tpu.pipeline_mode<synchronous>, transform_indices = @transform_4, window_bounds = array<i64: 96, 32>}, {pipeline_mode = #tpu.pipeline_mode<synchronous>, transform_indices = @transform_5, window_bounds = array<i64: 32, 64>}, {pipeline_mode = #tpu.pipeline_mode<synchronous>, transform_indices = @transform_6, window_bounds = array<i64: 3, 64>}, {transform_indices = @transform_7, window_bounds = array<i64: 4, 8, 32>}]} {
    %c0 = arith.constant 0 : index
    %c0_0 = arith.constant 0 : index
    %c0_1 = arith.constant 0 : index
    %0 = vector.load %arg1[%c0, %c0_0, %c0_1] : memref<4x8x32xf32, #tpu.memory_space<vmem>>, vector<4x8x32xf32>
    %1 = vector.shape_cast %0 : vector<4x8x32xf32> to vector<32x32xf32>
    %c0_2 = arith.constant 0 : index
    %c0_3 = arith.constant 0 : index
    %2 = vector.load %arg7[%c0_2, %c0_3] : memref<3x64xf32, #tpu.memory_space<vmem>>, vector<3x64xf32>
    %3 = vector.extract_strided_slice %2 {offsets = [0, 0], sizes = [1, 32], strides = [1, 1]} : vector<3x64xf32> to vector<1x32xf32>
    %4 = vector.extract_strided_slice %2 {offsets = [1, 0], sizes = [1, 64], strides = [1, 1]} : vector<3x64xf32> to vector<1x64xf32>
    %5 = vector.extract_strided_slice %2 {offsets = [2, 0], sizes = [1, 32], strides = [1, 1]} : vector<3x64xf32> to vector<1x32xf32>
    %cst = arith.constant dense<0.000000e+00> : vector<32xf32>
    %6 = vector.multi_reduction <add>, %1, %cst [1] : vector<32x32xf32> to vector<32xf32>
    %7 = vector.shape_cast %6 : vector<32xf32> to vector<32x1xf32>
    %cst_4 = arith.constant 3.200000e+01 : f32
    %8 = vector.broadcast %cst_4 : f32 to vector<32x1xf32>
    %9 = arith.divf %7, %8 : vector<32x1xf32>
    %10 = vector.broadcast %9 : vector<32x1xf32> to vector<32x32xf32>
    %11 = arith.subf %1, %10 : vector<32x32xf32>
    %12 = arith.mulf %11, %11 : vector<32x32xf32>
    %cst_5 = arith.constant dense<0.000000e+00> : vector<32xf32>
    %13 = vector.multi_reduction <add>, %12, %cst_5 [1] : vector<32x32xf32> to vector<32xf32>
    %14 = vector.shape_cast %13 : vector<32xf32> to vector<32x1xf32>
    %cst_6 = arith.constant 0.0322580636 : f32
    %15 = vector.broadcast %cst_6 : f32 to vector<32x1xf32>
    %16 = arith.mulf %14, %15 : vector<32x1xf32>
    %cst_7 = arith.constant 1.000000e+00 : f32
    %17 = vector.broadcast %cst_7 : f32 to vector<32x32xf32>
    %18 = arith.mulf %17, %11 : vector<32x32xf32>
    %cst_8 = arith.constant 9.99999997E-7 : f32
    %19 = vector.broadcast %cst_8 : f32 to vector<32x1xf32>
    %20 = arith.addf %16, %19 : vector<32x1xf32>
    %21 = math.rsqrt %20 : vector<32x1xf32>
    %22 = vector.broadcast %21 : vector<32x1xf32> to vector<32x32xf32>
    %23 = arith.mulf %18, %22 : vector<32x32xf32>
    %cst_9 = arith.constant 0.000000e+00 : f32
    %24 = vector.broadcast %cst_9 : f32 to vector<32x32xf32>
    %25 = arith.addf %23, %24 : vector<32x32xf32>
    %26 = arith.truncf %25 : vector<32x32xf32> to vector<32x32xbf16>
    %c0_10 = arith.constant 0 : index
    %c0_11 = arith.constant 0 : index
    %27 = vector.load %arg3[%c0_10, %c0_11] : memref<32x128xbf16, #tpu.memory_space<vmem>>, vector<32x128xbf16>
    %cst_12 = arith.constant dense<0.000000e+00> : vector<32x128xf32>
    %28 = tpu.matmul %26, %27, %cst_12 {dimension_numbers = #tpu.dot_dimension_numbers<[1], [0], [0], [1], [0, 0, 1, 1], [], []>} : vector<32x32xbf16>, vector<32x128xbf16>, vector<32x128xf32> -> vector<32x128xf32>
    %c0_13 = arith.constant 0 : index
    %c0_14 = arith.constant 0 : index
    %29 = vector.load %arg4[%c0_13, %c0_14] : memref<1x128xf32, #tpu.memory_space<vmem>>, vector<1x128xf32>
    %30 = vector.broadcast %29 : vector<1x128xf32> to vector<32x128xf32>
    %31 = arith.addf %28, %30 : vector<32x128xf32>
    %32 = arith.truncf %31 : vector<32x128xf32> to vector<32x128xbf16>
    %33 = vector.extract_strided_slice %32 {offsets = [0, 0], sizes = [32, 8], strides = [1, 1]} : vector<32x128xbf16> to vector<32x8xbf16>
    %34 = vector.extract_strided_slice %32 {offsets = [0, 8], sizes = [32, 8], strides = [1, 1]} : vector<32x128xbf16> to vector<32x8xbf16>
    %35 = vector.extract_strided_slice %32 {offsets = [0, 16], sizes = [32, 8], strides = [1, 1]} : vector<32x128xbf16> to vector<32x8xbf16>
    %36 = vector.extract_strided_slice %32 {offsets = [0, 24], sizes = [32, 8], strides = [1, 1]} : vector<32x128xbf16> to vector<32x8xbf16>
    %37 = tpu.concatenate %33, %34, %35, %36 in 0 : vector<32x8xbf16>, vector<32x8xbf16>, vector<32x8xbf16>, vector<32x8xbf16> -> vector<128x8xbf16>
    %38 = vector.shape_cast %37 : vector<128x8xbf16> to vector<16x8x8xbf16>
    %39 = vector.extract_strided_slice %32 {offsets = [0, 32], sizes = [32, 8], strides = [1, 1]} : vector<32x128xbf16> to vector<32x8xbf16>
    %40 = vector.extract_strided_slice %32 {offsets = [0, 40], sizes = [32, 8], strides = [1, 1]} : vector<32x128xbf16> to vector<32x8xbf16>
    %41 = vector.extract_strided_slice %32 {offsets = [0, 48], sizes = [32, 8], strides = [1, 1]} : vector<32x128xbf16> to vector<32x8xbf16>
    %42 = vector.extract_strided_slice %32 {offsets = [0, 56], sizes = [32, 8], strides = [1, 1]} : vector<32x128xbf16> to vector<32x8xbf16>
    %43 = tpu.concatenate %39, %40, %41, %42 in 0 : vector<32x8xbf16>, vector<32x8xbf16>, vector<32x8xbf16>, vector<32x8xbf16> -> vector<128x8xbf16>
    %44 = vector.shape_cast %43 : vector<128x8xbf16> to vector<16x8x8xbf16>
    %45 = vector.extract_strided_slice %32 {offsets = [0, 64], sizes = [32, 8], strides = [1, 1]} : vector<32x128xbf16> to vector<32x8xbf16>
    %46 = vector.extract_strided_slice %32 {offsets = [0, 72], sizes = [32, 8], strides = [1, 1]} : vector<32x128xbf16> to vector<32x8xbf16>
    %47 = vector.extract_strided_slice %32 {offsets = [0, 80], sizes = [32, 8], strides = [1, 1]} : vector<32x128xbf16> to vector<32x8xbf16>
    %48 = vector.extract_strided_slice %32 {offsets = [0, 88], sizes = [32, 8], strides = [1, 1]} : vector<32x128xbf16> to vector<32x8xbf16>
    %49 = tpu.concatenate %45, %46, %47, %48 in 0 : vector<32x8xbf16>, vector<32x8xbf16>, vector<32x8xbf16>, vector<32x8xbf16> -> vector<128x8xbf16>
    %50 = vector.shape_cast %49 : vector<128x8xbf16> to vector<16x8x8xbf16>
    %c0_15 = arith.constant 0 : index
    %c0_16 = arith.constant 0 : index
    %c0_17 = arith.constant 0 : index
    %51 = vector.load %arg2[%c0_15, %c0_16, %c0_17] : memref<4x1x8xf32, #tpu.memory_space<vmem>>, vector<4x1x8xf32>
    %52 = tpu.concatenate %51, %51, %51, %51 in 0 : vector<4x1x8xf32>, vector<4x1x8xf32>, vector<4x1x8xf32>, vector<4x1x8xf32> -> vector<16x1x8xf32>
    "tpu.trace_start"() <{level = 10 : i32, message = "zqd,zkd->zqk"}> : () -> ()
    %cst_18 = arith.constant dense<0.000000e+00> : vector<16x8x8xf32>
    %53 = tpu.matmul %38, %44, %cst_18 {dimension_numbers = #tpu.dot_dimension_numbers<[2], [2], [1], [1], [0, 0, 0, 1, 1, 1], [0], [0]>} : vector<16x8x8xbf16>, vector<16x8x8xbf16>, vector<16x8x8xf32> -> vector<16x8x8xf32>
    "tpu.trace_stop"() : () -> ()
    %54 = vector.broadcast %52 : vector<16x1x8xf32> to vector<16x8x8xf32>
    %55 = arith.addf %53, %54 : vector<16x8x8xf32>
    %cst_19 = arith.constant dense<0xFF800000> : vector<16x8xf32>
    %56 = vector.multi_reduction <maximumf>, %55, %cst_19 [2] : vector<16x8x8xf32> to vector<16x8xf32>
    %57 = vector.shape_cast %56 : vector<16x8xf32> to vector<16x8x1xf32>
    %58 = vector.broadcast %57 : vector<16x8x1xf32> to vector<16x8x8xf32>
    %59 = arith.subf %55, %58 : vector<16x8x8xf32>
    %60 = math.exp %59 : vector<16x8x8xf32>
    %cst_20 = arith.constant dense<0.000000e+00> : vector<16x8xf32>
    %61 = vector.multi_reduction <add>, %60, %cst_20 [2] : vector<16x8x8xf32> to vector<16x8xf32>
    %62 = vector.shape_cast %61 : vector<16x8xf32> to vector<16x8x1xf32>
    %63 = tpu.reciprocal %62 {approx = true} : vector<16x8x1xf32> -> vector<16x8x1xf32>
    %64 = vector.broadcast %63 : vector<16x8x1xf32> to vector<16x8x8xf32>
    %65 = arith.mulf %60, %64 : vector<16x8x8xf32>
    %66 = arith.truncf %65 : vector<16x8x8xf32> to vector<16x8x8xbf16>
    "tpu.trace_start"() <{level = 10 : i32, message = "zqk,zkd->zqd"}> : () -> ()
    %cst_21 = arith.constant dense<0.000000e+00> : vector<16x8x8xf32>
    %67 = tpu.matmul %66, %50, %cst_21 {dimension_numbers = #tpu.dot_dimension_numbers<[2], [1], [1], [2], [0, 0, 0, 1, 1, 2], [0], [0]>} : vector<16x8x8xbf16>, vector<16x8x8xbf16>, vector<16x8x8xf32> -> vector<16x8x8xf32>
    "tpu.trace_stop"() : () -> ()
    %68 = vector.shape_cast %67 : vector<16x8x8xf32> to vector<4x32x8xf32>
    %69 = vector.extract_strided_slice %68 {offsets = [0, 0, 0], sizes = [1, 32, 8], strides = [1, 1, 1]} : vector<4x32x8xf32> to vector<1x32x8xf32>
    %70 = vector.shape_cast %69 : vector<1x32x8xf32> to vector<32x8xf32>
    %71 = vector.extract_strided_slice %68 {offsets = [1, 0, 0], sizes = [1, 32, 8], strides = [1, 1, 1]} : vector<4x32x8xf32> to vector<1x32x8xf32>
    %72 = vector.shape_cast %71 : vector<1x32x8xf32> to vector<32x8xf32>
    %73 = vector.extract_strided_slice %68 {offsets = [2, 0, 0], sizes = [1, 32, 8], strides = [1, 1, 1]} : vector<4x32x8xf32> to vector<1x32x8xf32>
    %74 = vector.shape_cast %73 : vector<1x32x8xf32> to vector<32x8xf32>
    %75 = vector.extract_strided_slice %68 {offsets = [3, 0, 0], sizes = [1, 32, 8], strides = [1, 1, 1]} : vector<4x32x8xf32> to vector<1x32x8xf32>
    %76 = vector.shape_cast %75 : vector<1x32x8xf32> to vector<32x8xf32>
    %77 = tpu.concatenate %70, %72, %74, %76 in 1 : vector<32x8xf32>, vector<32x8xf32>, vector<32x8xf32>, vector<32x8xf32> -> vector<32x32xf32>
    %78 = arith.truncf %77 : vector<32x32xf32> to vector<32x32xbf16>
    %c0_22 = arith.constant 0 : index
    %c0_23 = arith.constant 0 : index
    %79 = vector.load %arg5[%c0_22, %c0_23] : memref<96x32xbf16, #tpu.memory_space<vmem>>, vector<32x32xbf16>
    %cst_24 = arith.constant dense<0.000000e+00> : vector<32x32xf32>
    %80 = tpu.matmul %78, %79, %cst_24 {dimension_numbers = #tpu.dot_dimension_numbers<[1], [0], [0], [1], [0, 0, 1, 1], [], []>} : vector<32x32xbf16>, vector<32x32xbf16>, vector<32x32xf32> -> vector<32x32xf32>
    %81 = vector.broadcast %3 : vector<1x32xf32> to vector<32x32xf32>
    %82 = arith.addf %80, %81 : vector<32x32xf32>
    %83 = arith.addf %1, %82 : vector<32x32xf32>
    %cst_25 = arith.constant dense<0.000000e+00> : vector<32xf32>
    %84 = vector.multi_reduction <add>, %83, %cst_25 [1] : vector<32x32xf32> to vector<32xf32>
    %85 = vector.shape_cast %84 : vector<32xf32> to vector<32x1xf32>
    %cst_26 = arith.constant 3.200000e+01 : f32
    %86 = vector.broadcast %cst_26 : f32 to vector<32x1xf32>
    %87 = arith.divf %85, %86 : vector<32x1xf32>
    %88 = vector.broadcast %87 : vector<32x1xf32> to vector<32x32xf32>
    %89 = arith.subf %83, %88 : vector<32x32xf32>
    %90 = arith.mulf %89, %89 : vector<32x32xf32>
    %cst_27 = arith.constant dense<0.000000e+00> : vector<32xf32>
    %91 = vector.multi_reduction <add>, %90, %cst_27 [1] : vector<32x32xf32> to vector<32xf32>
    %92 = vector.shape_cast %91 : vector<32xf32> to vector<32x1xf32>
    %cst_28 = arith.constant 0.0322580636 : f32
    %93 = vector.broadcast %cst_28 : f32 to vector<32x1xf32>
    %94 = arith.mulf %92, %93 : vector<32x1xf32>
    %cst_29 = arith.constant 1.000000e+00 : f32
    %95 = vector.broadcast %cst_29 : f32 to vector<32x32xf32>
    %96 = arith.mulf %95, %89 : vector<32x32xf32>
    %cst_30 = arith.constant 9.99999997E-7 : f32
    %97 = vector.broadcast %cst_30 : f32 to vector<32x1xf32>
    %98 = arith.addf %94, %97 : vector<32x1xf32>
    %99 = math.rsqrt %98 : vector<32x1xf32>
    %100 = vector.broadcast %99 : vector<32x1xf32> to vector<32x32xf32>
    %101 = arith.mulf %96, %100 : vector<32x32xf32>
    %cst_31 = arith.constant 0.000000e+00 : f32
    %102 = vector.broadcast %cst_31 : f32 to vector<32x32xf32>
    %103 = arith.addf %101, %102 : vector<32x32xf32>
    %104 = arith.truncf %103 : vector<32x32xf32> to vector<32x32xbf16>
    %c0_32 = arith.constant 0 : index
    %c0_33 = arith.constant 0 : index
    %105 = vector.load %arg6[%c0_32, %c0_33] : memref<32x64xbf16, #tpu.memory_space<vmem>>, vector<32x64xbf16>
    %cst_34 = arith.constant dense<0.000000e+00> : vector<32x64xf32>
    %106 = tpu.matmul %104, %105, %cst_34 {dimension_numbers = #tpu.dot_dimension_numbers<[1], [0], [0], [1], [0, 0, 1, 1], [], []>} : vector<32x32xbf16>, vector<32x64xbf16>, vector<32x64xf32> -> vector<32x64xf32>
    %107 = vector.broadcast %4 : vector<1x64xf32> to vector<32x64xf32>
    %108 = arith.addf %106, %107 : vector<32x64xf32>
    %cst_35 = arith.constant 0.000000e+00 : f32
    %109 = vector.broadcast %cst_35 : f32 to vector<32x64xf32>
    %110 = arith.maximumf %108, %109 : vector<32x64xf32>
    %111 = arith.truncf %110 : vector<32x64xf32> to vector<32x64xbf16>
    %c32 = arith.constant 32 : index
    %c0_36 = arith.constant 0 : index
    %112 = vector.load %arg5[%c32, %c0_36] : memref<96x32xbf16, #tpu.memory_space<vmem>>, vector<64x32xbf16>
    %cst_37 = arith.constant dense<0.000000e+00> : vector<32x32xf32>
    %113 = tpu.matmul %111, %112, %cst_37 {dimension_numbers = #tpu.dot_dimension_numbers<[1], [0], [0], [1], [0, 0, 1, 1], [], []>} : vector<32x64xbf16>, vector<64x32xbf16>, vector<32x32xf32> -> vector<32x32xf32>
    %114 = vector.broadcast %5 : vector<1x32xf32> to vector<32x32xf32>
    %115 = arith.addf %113, %114 : vector<32x32xf32>
    %116 = arith.addf %83, %115 : vector<32x32xf32>
    %117 = vector.shape_cast %116 : vector<32x32xf32> to vector<4x8x32xf32>
    %c0_38 = arith.constant 0 : index
    %c0_39 = arith.constant 0 : index
    %c0_40 = arith.constant 0 : index
    %118 = vector.load %arg8[%c0_38, %c0_39, %c0_40] : memref<4x8x32xf32, #tpu.memory_space<vmem>>, vector<4x8x32xf32>
    tpu.vector_store %arg8[%c0_38, %c0_39, %c0_40], %117 {strides = array<i32>} : memref<4x8x32xf32, #tpu.memory_space<vmem>>, vector<4x8x32xf32>,
    return
  }
  func.func @transform_0(%arg0: i32) -> (i32, i32, i32) {
    %c0_i32 = arith.constant 0 : i32
    %c0_i32_0 = arith.constant 0 : i32
    %c0_i32_1 = arith.constant 0 : i32
    return %arg0, %c0_i32, %c0_i32_0 : i32, i32, i32
  }
  func.func @transform_1(%arg0: i32) -> (i32, i32, i32) {
    %c0_i32 = arith.constant 0 : i32
    %c0_i32_0 = arith.constant 0 : i32
    %c0_i32_1 = arith.constant 0 : i32
    return %arg0, %c0_i32, %c0_i32_0 : i32, i32, i32
  }
  func.func @transform_2(%arg0: i32) -> (i32, i32) {
    %c0_i32 = arith.constant 0 : i32
    %c0_i32_0 = arith.constant 0 : i32
    %c0_i32_1 = arith.constant 0 : i32
    return %c0_i32, %c0_i32_0 : i32, i32
  }
  func.func @transform_3(%arg0: i32) -> (i32, i32) {
    %c0_i32 = arith.constant 0 : i32
    %c0_i32_0 = arith.constant 0 : i32
    %c0_i32_1 = arith.constant 0 : i32
    return %c0_i32, %c0_i32_0 : i32, i32
  }
  func.func @transform_4(%arg0: i32) -> (i32, i32) {
    %c0_i32 = arith.constant 0 : i32
    %c0_i32_0 = arith.constant 0 : i32
    %c0_i32_1 = arith.constant 0 : i32
    return %c0_i32, %c0_i32_0 : i32, i32
  }
  func.func @transform_5(%arg0: i32) -> (i32, i32) {
    %c0_i32 = arith.constant 0 : i32
    %c0_i32_0 = arith.constant 0 : i32
    %c0_i32_1 = arith.constant 0 : i32
    return %c0_i32, %c0_i32_0 : i32, i32
  }
  func.func @transform_6(%arg0: i32) -> (i32, i32) {
    %c0_i32 = arith.constant 0 : i32
    %c0_i32_0 = arith.constant 0 : i32
    %c0_i32_1 = arith.constant 0 : i32
    return %c0_i32, %c0_i32_0 : i32, i32
  }
  func.func @transform_7(%arg0: i32) -> (i32, i32, i32) {
    %c0_i32 = arith.constant 0 : i32
    %c0_i32_0 = arith.constant 0 : i32
    %c0_i32_1 = arith.constant 0 : i32
    return %arg0, %c0_i32, %c0_i32_0 : i32, i32, i32
  }
}

</mosaic_0001>

<bundles_post_ra>
// kernel: tpu_custom_call.1
= control target key start
LH: loop header
LB: loop body
LE: loop exit
PB: predicated region body
PF: predicated region fallthrough
CT: control target
= control target key end

     0   :  { %12 = vsyncpa [#allocation3], 0  ;;  %s2403_s0 = inlined_call_operand.vmem [shape: f32[4,8,32], index: 0, kind: input, shape index: {}]   ;;  %s2404_s1 = inlined_call_operand.hbm [shape: f32[4,1,8], index: 1, kind: input, shape index: {}]   ;;  %s2405_s2 = inlined_call_operand.vmem [shape: bf16[32,128], index: 2, kind: input, shape index: {}]   ;;  %s2406_s3 = inlined_call_operand.hbm [shape: f32[1,128], index: 3, kind: input, shape index: {}]   ;;  %s2407_s4 = inlined_call_operand.vmem [shape: bf16[96,32], index: 4, kind: input, shape index: {}]   ;;  %s2408_s5 = inlined_call_operand.vmem [shape: bf16[32,64], index: 5, kind: input, shape index: {}]   ;;  %s2409_s6 = inlined_call_operand.vmem [shape: f32[3,64], index: 6, kind: input, shape index: {}]   ;;  %s2410_s7 = inlined_call_operand.hbm [shape: f32[4,8,32], index: 7, kind: output, shape index: {}]  }
   0x1   :  { %13 = vsyncpa [#allocation6], 0 }
   0x2   :  { %14 = vsyncpa [#allocation4], 0  ;;  %s21_s26 = sshll.u32 %s2404_s1, 4  ;;  %s1790_s27 = smov [#allocation2]   ;;  %s22_s26 = int_to_ptr.hbm [resolvable:$true] %s21_s26 }
   0x3   :  { %s23_s28 = sshll.u32 %s1790_s27, 4  ;;  %s37_s8 = sshll.u32 %s2406_s3, 4  ;;  %s24_s28 = int_to_ptr.vmem [resolvable:$true] %s23_s28  ;;  %s38_s8 = int_to_ptr.hbm [resolvable:$true] %s37_s8 }
   0x4   :  { %s1791_s9 = smov 16   ;;  %s1792_s10 = smov 1  }
   0x5   :  { %29 = dma.hbm_to_vmem [thread:$0]  %s22_s26, 64, %s24_s28, [#allocation3], %s1791_s9, %s1791_s9, %s1792_s10  }
   0x6   :  { %s1793_s11 = smov [#allocation5]  }
   0x7   :  { %s39_s12 = sshll.u32 %s1793_s11, 4  ;;  %s40_s12 = int_to_ptr.vmem [resolvable:$true] %s39_s12 }
   0x8   :  { %42 = dma.hbm_to_vmem [thread:$0]  %s38_s8, 16, %s40_s12, [#allocation6]  }
   0x9   :  { %1784 = dma.done.wait [#allocation3], 64  }
   0xa   :  { %1785 = vsyncadd [#allocation3], 4294967232 }
   0xb   :  { %1786 = dma.done.wait [#allocation6], 16  }
   0xc   :  { %1787 = vsyncadd [#allocation6], 4294967280  ;;  %vm63_vm0 = vcmask 261120   ;;  %v60_v0 = vld [vmem:[%s2403_s0 + $0x10] sm:$0xff]  ;;  %v58_v1 = vld [vmem:[%s2403_s0] sm:$0xff]  ;;  %v1794_v8 = vmov 32.0  }
   0xd   :  { %v70_v2 = vsel %vm63_vm0, %v60_v0, 0.0  ;;  %v64_v3 = vsel %vm63_vm0, %v58_v1, 0.0  ;;  %v61_v4 = vld [vmem:[%s2403_s0 + $0x18] sm:$0xff]  ;;  %v59_v5 = vld [vmem:[%s2403_s0 + $0x8] sm:$0xff]  ;;  %1626 = vrcp.f32 %v1794_v8  ;;  %v1565_v36 = vld [vmem:[%s2405_s2] sm:$0xff]  ;;  %s1796_s23 = smov 112  }
   0xe   :  { %71 = vadd.xlane.f32.xlu1 %v70_v2  ;;  %65 = vadd.xlane.f32.xlu0 %v64_v3  ;;  %v73_v6 = vsel %vm63_vm0, %v61_v4, 0.0  ;;  %v67_v7 = vsel %vm63_vm0, %v59_v5, 0.0  ;;  %v1566_v35 = vld [vmem:[%s2405_s2 + $0x8] sm:$0xff]  ;;  %s1795_s2 = smov 96   ;;  %s1797_s24 = smov 120   ;;  %vm282_vm14 = vcmask 64512  }
   0xf   :  { %197 = vmatpush.bf16.msra.mxu0 %v1566_v35  ;;  %1575 = vmatpush.bf16.msra.mxu1 %v1566_v35  ;;  %s1798_s25 = smov 104   ;;  %s1799_s26 = smov 64   ;;  %vm814_vm15 = vcmask 1043456  }
  0x10   :  { %s1800_s27 = smov 8   ;;  %s1801_s28 = smov 24  }
  0x11   :  { %s1802_s29 = smov [#allocation7]   ;;  %s1803_s8 = smov 128  }
  0x12   :  { %s1469_s30 = sshll.u32 %s1802_s29, 4  ;;  %s1470_s30 = int_to_ptr.vmem [resolvable:$true] %s1469_s30 }
  0x13   :  { %v1627_v9 = vpop.eup %1626  ;;  %198 = vmatpush.bf16.msra.mxu0 %v1565_v36  ;;  %1576 = vmatpush.bf16.msra.mxu1 %v1565_v36 }
  0x14   :  { %v77_v10 = vmul.f32 32.0, %v1627_v9  ;;  %vm81_vm1 = vweird.f32 %v1627_v9 }
  0x16   :  { %74 = vadd.xlane.f32.xlu1 %v73_v6  ;;  %68 = vadd.xlane.f32.xlu0 %v67_v7  ;;  %v78_v11 = vsub.f32 1.0, %v77_v10 }
  0x18   :  { %v79_v12 = vmul.f32 %v1627_v9, %v78_v11 }
  0x1a   :  { %v80_v13 = vadd.f32 %v1627_v9, %v79_v12 }
  0x1c   :  { %v1868_v14 = vsel %vm81_vm1, %v1627_v9, %v80_v13  ;;  %vm1198_vm1 = vcmask 130048  }
  0x81   :  { %v72_v15 = vpop.xlane.xlu1 %71  ;;  %v66_v16 = vpop.xlane.xlu0 %65 }
  0x82   :  { %v85_v17 = vmul.f32 %v1868_v14, %v72_v15  ;;  %v83_v18 = vmul.f32 %v1868_v14, %v66_v16 }
  0x84   :  { %v1872_v19 = vsub.f32 %v60_v0, %v85_v17  ;;  %v1874_v20 = vsub.f32 %v58_v1, %v83_v18 }
  0x86   :  { %v93_v21 = vmul.f32 %v1872_v19, %v1872_v19  ;;  %v91_v22 = vmul.f32 %v1874_v20, %v1874_v20 }
  0x88   :  { %v101_v23 = vsel %vm63_vm0, %v93_v21, 0.0  ;;  %v95_v24 = vsel %vm63_vm0, %v91_v22, 0.0 }
  0x89   :  { %v75_v25 = vpop.xlane.xlu1 %74  ;;  %102 = vadd.xlane.f32.xlu0 %v101_v23  ;;  %96 = vadd.xlane.f32.xlu2 %v95_v24  ;;  %v69_v26 = vpop.xlane.xlu0 %68  ;;  %v1621_v24 = vld [vmem:[#allocation5] ss:$0 sm:$0xff] }
  0x8a   :  { %v86_v27 = vmul.f32 %v1868_v14, %v75_v25  ;;  %v84_v28 = vmul.f32 %v1868_v14, %v69_v26 }
  0x8c   :  { %v1884_v29 = vsub.f32 %v61_v4, %v86_v27  ;;  %v1886_v30 = vsub.f32 %v59_v5, %v84_v28 }
  0x8e   :  { %v94_v31 = vmul.f32 %v1884_v29, %v1884_v29  ;;  %v92_v32 = vmul.f32 %v1886_v30, %v1886_v30 }
  0x90   :  { %v104_v33 = vsel %vm63_vm0, %v94_v31, 0.0  ;;  %v98_v34 = vsel %vm63_vm0, %v92_v32, 0.0 }
  0x91   :  { %105 = vadd.xlane.f32.xlu1 %v104_v33  ;;  %99 = vadd.xlane.f32.xlu2 %v98_v34 }
  0xfc   :  { %v97_v37 = vpop.xlane.xlu2 %96  ;;  %v103_v38 = vpop.xlane.xlu0 %102 }
  0xfd   :  { %v107_v39 = vmul.f32 0.032258064, %v97_v37  ;;  %v109_v40 = vmul.f32 0.032258064, %v103_v38 }
  0xff   :  { %v111_v41 = vadd.f32 1e-06, %v107_v39  ;;  %v113_v42 = vadd.f32 1e-06, %v109_v40 }
 0x101   :  { %1628 = vrsqrt.f32 %v111_v41  ;;  %vm141_vm2 = vweird.f32 %v113_v42  ;;  %vm121_vm7 = vweird.f32 %v111_v41 }
 0x102   :  { %1630 = vrsqrt.f32 %v113_v42 }
 0x104   :  { %v106_v43 = vpop.xlane.xlu1 %105  ;;  %v100_v44 = vpop.xlane.xlu2 %99 }
 0x105   :  { %v110_v45 = vmul.f32 0.032258064, %v106_v43  ;;  %v108_v46 = vmul.f32 0.032258064, %v100_v44 }
 0x107   :  { %v1629_v47 = vpop.eup %1628  ;;  %v114_v48 = vadd.f32 1e-06, %v110_v45  ;;  %v112_v49 = vadd.f32 1e-06, %v108_v46 }
 0x108   :  { %v1631_v50 = vpop.eup %1630  ;;  %v116_v51 = vmul.f32 %v1629_v47, %v111_v41  ;;  %vm122_vm4 = vweird.f32 %v1629_v47 }
 0x109   :  { %v136_v52 = vmul.f32 %v1631_v50, %v113_v42  ;;  %1632 = vrsqrt.f32 %v114_v48  ;;  %vm142_vm3 = vweird.f32 %v1631_v50  ;;  %vm151_vm5 = vweird.f32 %v114_v48  ;;  %vm123_vm10 = vmor %vm121_vm7, %vm122_vm4 }
 0x10a   :  { %v117_v53 = vmul.f32 %v1629_v47, %v116_v51  ;;  %1634 = vrsqrt.f32 %v112_v49  ;;  %vm143_vm8 = vmor %vm141_vm2, %vm142_vm3  ;;  %vm131_vm12 = vweird.f32 %v112_v49  ;;  %vm1203_vm2 = vcmask 195584  }
 0x10b   :  { %v137_v54 = vmul.f32 %v1631_v50, %v136_v52 }
 0x10c   :  { %v118_v55 = vmul.f32 0.5, %v117_v53 }
 0x10d   :  { %v138_v56 = vmul.f32 0.5, %v137_v54 }
 0x10e   :  { %v119_v61 = vsub.f32 1.5, %v118_v55 }
 0x10f   :  { %v1633_v57 = vpop.eup %1632  ;;  %v139_v59 = vsub.f32 1.5, %v138_v56 }
 0x110   :  { %v1635_v58 = vpop.eup %1634  ;;  %v146_v60 = vmul.f32 %v1633_v57, %v114_v48  ;;  %v120_v3 = vmul.f32 %v1629_v47, %v119_v61  ;;  %vm152_vm6 = vweird.f32 %v1633_v57 }
 0x111   :  { %v126_v62 = vmul.f32 %v1635_v58, %v112_v49  ;;  %v140_v1 = vmul.f32 %v1631_v50, %v139_v59  ;;  %vm132_vm9 = vweird.f32 %v1635_v58  ;;  %vm153_vm11 = vmor %vm151_vm5, %vm152_vm6 }
 0x112   :  { %v147_v63 = vmul.f32 %v1633_v57, %v146_v60  ;;  %v124_v10 = vsel %vm123_vm10, %v1629_v47, %v120_v3  ;;  %vm133_vm13 = vmor %vm131_vm12, %vm132_vm9 }
 0x113   :  { %v127_v0 = vmul.f32 %v1635_v58, %v126_v62  ;;  %v144_v8 = vsel %vm143_vm8, %v1631_v50, %v140_v1  ;;  %v155_v16 = vmul.f32 %v124_v10, %v1874_v20 }
 0x114   :  { %v148_v2 = vmul.f32 0.5, %v147_v63  ;;  %v157_v13 = vmul.f32 %v144_v8, %v1872_v19 }
 0x115   :  { %v128_v4 = vmul.f32 0.5, %v127_v0 }
 0x116   :  { %v149_v5 = vsub.f32 1.5, %v148_v2 }
 0x117   :  { %v129_v6 = vsub.f32 1.5, %v128_v4 }
 0x118   :  { %v150_v7 = vmul.f32 %v1633_v57, %v149_v5 }
 0x119   :  { %v130_v9 = vmul.f32 %v1635_v58, %v129_v6 }
 0x11a   :  { %v154_v11 = vsel %vm153_vm11, %v1633_v57, %v150_v7 }
 0x11b   :  { %v134_v12 = vsel %vm133_vm13, %v1635_v58, %v130_v9  ;;  %v158_v15 = vmul.f32 %v154_v11, %v1884_v29 }
 0x11c   :  { %v156_v17 = vmul.f32 %v134_v12, %v1886_v30 }
 0x11d   :  { %v164_v18 = vpack.c.bf16 %v158_v15, %v157_v13 }
 0x11e   :  { %v163_v21 = vpack.c.bf16 %v156_v17, %v155_v16 }
 0x11f   :  { %1494 = vmatmul.msk.bf16.vlgmr.msra.gmra.mxu1 %vm63_vm0, %v164_v18 }
 0x120   :  { %1493 = vmatmul.msk.bf16.vlgmr.msra.gmra.mxu0 %vm63_vm0, %v163_v21 }
 0x19c   :  { %v205_v22 = vpop.f32.mrf.mxu1 }
 0x19d   :  { %v200_v23 = vpop.f32.mrf.mxu0  ;;  %v206_v32 = vadd.f32 %v1621_v24, %v205_v22 }
 0x19e   :  { %v201_v25 = vadd.f32 %v1621_v24, %v200_v23 }
 0x19f   :  { %v212_v36 = vpack.c.bf16 %v206_v32, %v206_v32 }
 0x1a0   :  { %v210_v28 = vpack.c.bf16 %v201_v25, %v201_v25 }
 0x1a1   :  { %v220_v38 = vunpack.c.l.b16 %v212_v36 }
 0x1a2   :  { %v218_v20 = vunpack.c.l.b16 %v210_v28 }
 0x1a3   :  { %v250_v41 = vpack.c.b16 %v220_v38, %v220_v38 }
 0x1a4   :  { %v207_v27 = vpop.f32.mrf.mxu1  ;;  %v1910_v39 = vpack.c.b16 %v218_v20, %v218_v20 }
 0x1a5   :  { %v202_v26 = vpop.f32.mrf.mxu0  ;;  %v208_v29 = vadd.f32 %v1621_v24, %v207_v27 }
 0x1a6   :  { %v203_v19 = vadd.f32 %v1621_v24, %v202_v26 }
 0x1a7   :  { %v213_v35 = vpack.c.bf16 %v208_v29, %v208_v29 }
 0x1a8   :  { %v211_v31 = vpack.c.bf16 %v203_v19, %v203_v19 }
 0x1a9   :  { %v221_v37 = vunpack.c.l.b16 %v213_v35 }
 0x1aa   :  { %v219_v33 = vunpack.c.l.b16 %v211_v31 }
 0x1ab   :  { %v223_v40 = vpack.c.b16 %v221_v37, %v220_v38  ;;  %v1921_v49 = vpack.c.b16 %v221_v37, %v221_v37 }
 0x1ac   :  { %v222_v30 = vpack.c.b16 %v219_v33, %v218_v20  ;;  %v1906_v34 = vpack.c.b16 %v219_v33, %v219_v33 }
 0x1ae   :  { %302 = vrot.lane.b32.xlu1 %v1906_v34, %s1795_s2  ;;  %228 = vrot.lane.b32.xlu0 %v222_v30, %s1796_s23 }
 0x1af   :  { %224 = vrot.lane.b32.xlu2 %v222_v30, %s1797_s24 }
 0x1b6   :  { %280 = vrot.lane.b32.xlu1 %v1910_v39, %s1795_s2  ;;  %226 = vrot.lane.b32.xlu0 %v223_v40, %s1797_s24 }
 0x1b7   :  { %323 = vrot.lane.b32.xlu2 %v250_v41, %s1795_s2 }
 0x1be   :  { %230 = vrot.lane.b32.xlu1 %v223_v40, %s1796_s23 }
 0x1bf   :  { %232 = vrot.lane.b32.xlu2 %v222_v30, %s1798_s25 }
 0x209   :  { %v225_v42 = vpop.permute.xlu2 %224 }
 0x20a   :  { %v236_v43 = vunpack.c.l.b16 %v225_v42  ;;  %v237_v44 = vunpack.c.h.b16 %v225_v42 }
 0x20c   :  { %v1915_v45 = vpack.c.b16 %v236_v43, %v236_v43  ;;  %v253_v46 = vpack.c.b16 %v237_v44, %v237_v44 }
 0x20e   :  { %386 = vrot.lane.b32.xlu2 %v253_v46, %s1795_s2  ;;  %365 = vrot.lane.b32.xlu0 %v1915_v45, %s1795_s2 }
 0x211   :  { %v324_v47 = vpop.permute.xlu2 %323 }
 0x212   :  { %v329_v48 = vsel %vm282_vm14, %v324_v47, 0  ;;  %v2023_v47 = vld [vmem:[#allocation2 + $0x2] ss:$0 sm:$0xff] }
 0x213   :  { %338 = vmatpush.bf16.xpose.msra.mxu3 %v329_v48 }
 0x216   :  { %344 = vrot.lane.b32.xlu0 %v1921_v49, %s1795_s2 }
 0x219   :  { %v233_v50 = vpop.permute.xlu2 %232 }
 0x21a   :  { %1497 = vmatmul.msk.bf16.vlgmr.msra.gmra.mxu3 %vm282_vm14, %v250_v41  ;;  %v244_v51 = vunpack.c.l.b16 %v233_v50  ;;  %v245_v3 = vunpack.c.h.b16 %v233_v50 }
 0x21c   :  { %v1931_v59 = vpack.c.b16 %v244_v51, %v244_v51  ;;  %v1956_v9 = vpack.c.b16 %v245_v3, %v245_v3 }
 0x21e   :  { %234 = vrot.lane.b32.xlu0 %v223_v40, %s1798_s25 }
 0x220   :  { %v303_v52 = vpop.permute.xlu1 %302  ;;  %v229_v53 = vpop.permute.xlu0 %228 }
 0x221   :  { %v240_v54 = vunpack.c.l.b16 %v229_v53  ;;  %v241_v55 = vunpack.c.h.b16 %v229_v53  ;;  %v308_v56 = vsel %vm282_vm14, %v303_v52, 0 }
 0x222   :  { %317 = vmatpush.bf16.xpose.msra.mxu2 %v308_v56 }
 0x223   :  { %v1927_v57 = vpack.c.b16 %v240_v54, %v240_v54  ;;  %v1929_v58 = vpack.c.b16 %v241_v55, %v241_v55 }
 0x225   :  { %470 = vrot.lane.b32.xlu1 %v1929_v58, %s1795_s2  ;;  %449 = vrot.lane.b32.xlu2 %v1927_v57, %s1795_s2 }
 0x226   :  { %533 = vrot.lane.b32.xlu0 %v1931_v59, %s1795_s2 }
 0x228   :  { %v281_v60 = vpop.permute.xlu1 %280  ;;  %v227_v61 = vpop.permute.xlu0 %226 }
 0x229   :  { %v238_v62 = vunpack.c.l.b16 %v227_v61  ;;  %v239_v63 = vunpack.c.h.b16 %v227_v61  ;;  %1496 = vmatmul.msk.bf16.vlgmr.msra.gmra.mxu2 %vm282_vm14, %v1906_v34  ;;  %v287_v0 = vsel %vm282_vm14, %v281_v60, 0 }
 0x22a   :  { %296 = vmatpush.bf16.xpose.msrb.mxu1 %v287_v0 }
 0x22b   :  { %v1942_v1 = vpack.c.b16 %v238_v62, %v238_v62  ;;  %v1944_v2 = vpack.c.b16 %v239_v63, %v239_v63 }
 0x22d   :  { %428 = vrot.lane.b32.xlu1 %v1944_v2, %s1795_s2  ;;  %407 = vrot.lane.b32.xlu2 %v1942_v1, %s1795_s2 }
 0x230   :  { %v231_v4 = vpop.permute.xlu1 %230 }
 0x231   :  { %v242_v5 = vunpack.c.l.b16 %v231_v4  ;;  %v243_v6 = vunpack.c.h.b16 %v231_v4  ;;  %1495 = vmatmul.msk.bf16.vlgmr.msrb.gmra.mxu1 %vm282_vm14, %v1910_v39 }
 0x233   :  { %v1952_v7 = vpack.c.b16 %v242_v5, %v242_v5  ;;  %v1954_v8 = vpack.c.b16 %v243_v6, %v243_v6  ;;  %v2051_v6 = vld [vmem:[#allocation2 + $0x3] ss:$0 sm:$0xff] }
 0x235   :  { %512 = vrot.lane.b32.xlu0 %v1954_v8, %s1795_s2  ;;  %491 = vrot.lane.b32.xlu1 %v1952_v7, %s1795_s2 }
 0x236   :  { %554 = vrot.lane.b32.xlu2 %v1956_v9, %s1795_s2 }
 0x23d   :  { %852 = vrot.lane.b32.xlu0 %v250_v41, %s1799_s26 }
 0x245   :  { %894 = vrot.lane.b32.xlu0 %v1915_v45, %s1799_s26 }
 0x24d   :  { %915 = vrot.lane.b32.xlu0 %v253_v46, %s1799_s26 }
 0x268   :  { %v387_v10 = vpop.permute.xlu2 %386 }
 0x269   :  { %v392_v11 = vsel %vm282_vm14, %v387_v10, 0 }
 0x26a   :  { %401 = vmatpush.bf16.xpose.msrb.mxu3 %v392_v11 }
 0x271   :  { %1500 = vmatmul.msk.bf16.vlgmr.msrb.gmra.mxu3 %vm282_vm14, %v253_v46 }
 0x27f   :  { %v450_v12 = vpop.permute.xlu2 %449 }
 0x280   :  { %v455_v13 = vsel %vm282_vm14, %v450_v12, 0  ;;  %v366_v15 = vpop.permute.xlu0 %365 }
 0x281   :  { %v371_v16 = vsel %vm282_vm14, %v366_v15, 0 }
 0x282   :  { %380 = vmatpush.bf16.xpose.msrb.mxu2 %v371_v16 }
 0x287   :  { %v408_v17 = vpop.permute.xlu2 %407 }
 0x288   :  { %v345_v18 = vpop.permute.xlu0 %344  ;;  %v413_v21 = vsel %vm282_vm14, %v408_v17, 0 }
 0x289   :  { %v350_v22 = vsel %vm282_vm14, %v345_v18, 0  ;;  %1499 = vmatmul.msk.bf16.vlgmr.msrb.gmra.mxu2 %vm282_vm14, %v1915_v45  ;;  %422 = vmatpush.bf16.xpose.msrb.mxu0 %v413_v21 }
 0x28a   :  { %464 = vmatpush.bf16.xpose.msra.mxu2 %v455_v13  ;;  %359 = vmatpush.bf16.xpose.msra.mxu1 %v350_v22 }
 0x290   :  { %v235_v23 = vpop.permute.xlu0 %234  ;;  %1501 = vmatmul.msk.bf16.vlgmr.msrb.gmra.mxu0 %vm282_vm14, %v1942_v1  ;;  %v555_v28 = vpop.permute.xlu2 %554 }
 0x291   :  { %v246_v24 = vunpack.c.l.b16 %v235_v23  ;;  %v247_v25 = vunpack.c.h.b16 %v235_v23  ;;  %1498 = vmatmul.msk.bf16.vlgmr.msra.gmra.mxu1 %vm282_vm14, %v1921_v49  ;;  %v560_v32 = vsel %vm282_vm14, %v555_v28, 0 }
 0x293   :  { %v1980_v26 = vpack.c.b16 %v246_v24, %v246_v24  ;;  %v1982_v27 = vpack.c.b16 %v247_v25, %v247_v25 }
 0x295   :  { %596 = vrot.lane.b32.xlu1 %v1982_v27, %s1795_s2  ;;  %575 = vrot.lane.b32.xlu2 %v1980_v26, %s1795_s2 }
 0x297   :  { %v471_v19 = vpop.permute.xlu1 %470 }
 0x298   :  { %v476_v31 = vsel %vm282_vm14, %v471_v19, 0  ;;  %v534_v29 = vpop.permute.xlu0 %533 }
 0x299   :  { %v539_v20 = vsel %vm282_vm14, %v534_v29, 0  ;;  %1503 = vmatmul.msk.bf16.vlgmr.msra.gmra.mxu2 %vm282_vm14, %v1927_v57  ;;  %485 = vmatpush.bf16.xpose.msra.mxu3 %v476_v31 }
 0x29a   :  { %548 = vmatpush.bf16.xpose.msrb.mxu2 %v539_v20 }
 0x29d   :  { %v340_v33 = vpop.f32.mrf.mxu3  ;;  %831 = vrot.lane.b32.xlu1 %v1906_v34, %s1799_s26  ;;  %809 = vrot.lane.b32.xlu2 %v1910_v39, %s1799_s26  ;;  %v2008_v39 = vld [vmem:[#allocation2] ss:$0 sm:$0xff] }
 0x29e   :  { %v2026_v48 = vadd.f32 %v2023_v47, %v340_v33 }
 0x29f   :  { %v429_v30 = vpop.permute.xlu1 %428 }
 0x2a0   :  { %v434_v35 = vsel %vm282_vm14, %v429_v30, 0  ;;  %1504 = vmatmul.msk.bf16.vlgmr.msra.gmra.mxu3 %vm282_vm14, %v1929_v58  ;;  %v623_v50 = vsel %vm282_vm14, %v2026_v48, -inf }
 0x2a1   :  { %569 = vmatpush.bf16.xpose.msrb.mxu3 %v560_v32  ;;  %443 = vmatpush.bf16.xpose.msrb.mxu1 %v434_v35 }
 0x2a5   :  { %v342_v36 = vpop.f32.mrf.mxu3  ;;  %873 = vrot.lane.b32.xlu2 %v1921_v49, %s1799_s26  ;;  %v2028_v49 = vld [vmem:[#allocation2 + $0x1] ss:$0 sm:$0xff] }
 0x2a7   :  { %v492_v37 = vpop.permute.xlu1 %491  ;;  %v513_v38 = vpop.permute.xlu0 %512 }
 0x2a8   :  { %v497_v40 = vsel %vm282_vm14, %v492_v37, 0  ;;  %v518_v34 = vsel %vm282_vm14, %v513_v38, 0  ;;  %1502 = vmatmul.msk.bf16.vlgmr.msrb.gmra.mxu1 %vm282_vm14, %v1944_v2 }
 0x2a9   :  { %1507 = vmatmul.msk.bf16.vlgmr.msrb.gmra.mxu2 %vm282_vm14, %v1931_v59  ;;  %506 = vmatpush.bf16.xpose.msra.mxu0 %v497_v40 }
 0x2aa   :  { %527 = vmatpush.bf16.xpose.msra.mxu1 %v518_v34 }
 0x2ac   :  { %v319_v41 = vpop.f32.mrf.mxu2 }
 0x2ad   :  { %978 = vrot.lane.b32.xlu2 %v1927_v57, %s1799_s26  ;;  %v2033_v51 = vadd.f32 %v2028_v49, %v319_v41 }
 0x2ae   :  { %v298_v42 = vpop.f32.mrf.mxu1 }
 0x2af   :  { %v2013_v43 = vadd.f32 %v2008_v39, %v298_v42  ;;  %v620_v52 = vsel %vm282_vm14, %v2033_v51, -inf  ;;  %v853_v53 = vpop.permute.xlu0 %852 }
 0x2b0   :  { %1505 = vmatmul.msk.bf16.vlgmr.msra.gmra.mxu0 %vm282_vm14, %v1952_v7  ;;  %1508 = vmatmul.msk.bf16.vlgmr.msrb.gmra.mxu3 %vm282_vm14, %v1956_v9  ;;  %v858_v56 = vsel %vm814_vm15, %v853_v53, 0 }
 0x2b1   :  { %v617_v44 = vsel %vm282_vm14, %v2013_v43, -inf }
 0x2b2   :  { %618 = vmax.xlane.f32.xlu0 %v617_v44 }
 0x2b4   :  { %v321_v45 = vpop.f32.mrf.mxu2 }
 0x2b6   :  { %v300_v46 = vpop.f32.mrf.mxu1 }
 0x2b7   :  { %v895_v60 = vpop.permute.xlu0 %894 }
 0x2b8   :  { %1506 = vmatmul.msk.bf16.vlgmr.msra.gmra.mxu1 %vm282_vm14, %v1954_v8  ;;  %v900_v63 = vsel %vm814_vm15, %v895_v60, 0 }
 0x2bf   :  { %v916_v12 = vpop.permute.xlu0 %915 }
 0x2c0   :  { %v921_v17 = vsel %vm814_vm15, %v916_v12, 0 }
 0x2d6   :  { %624 = vmax.xlane.f32.xlu2 %v623_v50 }
 0x2de   :  { %621 = vmax.xlane.f32.xlu2 %v620_v52 }
 0x2ef   :  { %v576_v54 = vpop.permute.xlu2 %575 }
 0x2f0   :  { %v581_v55 = vsel %vm282_vm14, %v576_v54, 0 }
 0x2f1   :  { %590 = vmatpush.bf16.xpose.msrb.mxu0 %v581_v55 }
 0x2f4   :  { %v2039_v57 = vpop.f32.mrf.mxu3 }
 0x2f6   :  { %936 = vrot.lane.b32.xlu2 %v1942_v1, %s1799_s26 }
 0x2f7   :  { %v810_v61 = vpop.permute.xlu2 %809 }
 0x2f8   :  { %v816_v62 = vsel %vm814_vm15, %v810_v61, 0  ;;  %1509 = vmatmul.msk.bf16.vlgmr.msrb.gmra.mxu0 %vm282_vm14, %v1980_v26 }
 0x2f9   :  { %867 = vmatpush.bf16.msra.mxu0 %v858_v56  ;;  %825 = vmatpush.bf16.msra.mxu2 %v816_v62 }
 0x2fc   :  { %v405_v0 = vpop.f32.mrf.mxu3 }
 0x2fd   :  { %909 = vmatpush.bf16.msrb.mxu2 %v900_v63 }
 0x2fe   :  { %957 = vrot.lane.b32.xlu2 %v1944_v2, %s1799_s26 }
 0x2ff   :  { %v874_v3 = vpop.permute.xlu2 %873 }
 0x300   :  { %v879_v1 = vsel %vm814_vm15, %v874_v3, 0 }
 0x307   :  { %v597_v4 = vpop.permute.xlu1 %596  ;;  %v2088_v54 = vpop.permute.xlu2 %978 }
 0x308   :  { %v602_v5 = vsel %vm282_vm14, %v597_v4, 0 }
 0x309   :  { %611 = vmatpush.bf16.xpose.msrb.mxu1 %v602_v5 }
 0x30c   :  { %v382_v10 = vpop.f32.mrf.mxu2 }
 0x30d   :  { %v424_v11 = vpop.f32.mrf.mxu0  ;;  %v2070_v19 = vadd.f32 %v2008_v39, %v382_v10 }
 0x30e   :  { %v361_v13 = vpop.f32.mrf.mxu1  ;;  %v2063_v22 = vadd.f32 %v2023_v47, %v424_v11 }
 0x30f   :  { %v2054_v15 = vadd.f32 %v2051_v6, %v361_v13  ;;  %v832_v16 = vpop.permute.xlu1 %831  ;;  %v629_v31 = vsel %vm282_vm14, %v2070_v19, -inf  ;;  %v2121_v13 = vadd.f32 %v2028_v49, %v2039_v57 }
 0x310   :  { %v837_v2 = vsel %vm814_vm15, %v832_v16, 0  ;;  %1510 = vmatmul.msk.bf16.vlgmr.msrb.gmra.mxu1 %vm282_vm14, %v1982_v27  ;;  %v635_v25 = vsel %vm282_vm14, %v2063_v22, -inf }
 0x311   :  { %888 = vmatpush.bf16.msra.mxu1 %v879_v1  ;;  %846 = vmatpush.bf16.msra.mxu3 %v837_v2  ;;  %v626_v18 = vsel %vm282_vm14, %v2054_v15, -inf }
 0x312   :  { %627 = vmax.xlane.f32.xlu1 %v626_v18 }
 0x314   :  { %v384_v21 = vpop.f32.mrf.mxu2 }
 0x315   :  { %930 = vmatpush.bf16.msrb.mxu3 %v921_v17  ;;  %v426_v23 = vpop.f32.mrf.mxu0  ;;  %v632_v17 = vsel %vm282_vm14, %v2121_v13, -inf }
 0x316   :  { %v363_v24 = vpop.f32.mrf.mxu1 }
 0x31a   :  { %636 = vmax.xlane.f32.xlu1 %v635_v25 }
 0x31c   :  { %v2067_v28 = vpop.f32.mrf.mxu2 }
 0x322   :  { %630 = vmax.xlane.f32.xlu1 %v629_v31 }
 0x323   :  { %v487_v29 = vpop.f32.mrf.mxu3 }
 0x324   :  { %v468_v32 = vpop.f32.mrf.mxu2 }
 0x325   :  { %v445_v20 = vpop.f32.mrf.mxu1  ;;  %v619_v33 = vpop.xlane.xlu0 %618 }
 0x326   :  { %v2075_v30 = vadd.f32 %v2051_v6, %v445_v20  ;;  %v665_v35 = vsub.f32 %v2013_v43, %v619_v33 }
 0x328   :  { %v681_v36 = vmul.f32 1.442695, %v665_v35  ;;  %v638_v37 = vsel %vm282_vm14, %v2075_v30, -inf }
 0x329   :  { %639 = vmax.xlane.f32.xlu0 %v638_v37 }
 0x32a   :  { %1636 = vpow2.f32 %v681_v36 }
 0x32b   :  { %v489_v38 = vpop.f32.mrf.mxu3 }
 0x32c   :  { %v2080_v40 = vpop.f32.mrf.mxu2 }
 0x32d   :  { %v447_v34 = vpop.f32.mrf.mxu1  ;;  %v508_v41 = vpop.f32.mrf.mxu0 }
 0x32e   :  { %v2112_v10 = vadd.f32 %v2023_v47, %v508_v41 }
 0x330   :  { %v2082_v42 = vpop.eup %1636  ;;  %v647_v11 = vsel %vm282_vm14, %v2112_v10, -inf }
 0x331   :  { %v713_v44 = vsel %vm282_vm14, %v2082_v42, 0.0 }
 0x332   :  { %714 = vadd.xlane.f32.xlu0 %v713_v44 }
 0x333   :  { %v571_v45 = vpop.f32.mrf.mxu3 }
 0x334   :  { %v552_v46 = vpop.f32.mrf.mxu2  ;;  %v2117_v12 = vadd.f32 %v2028_v49, %v571_v45 }
 0x335   :  { %v510_v43 = vpop.f32.mrf.mxu0  ;;  %v529_v50 = vpop.f32.mrf.mxu1 }
 0x336   :  { %v656_v16 = vsel %vm282_vm14, %v2117_v12, -inf  ;;  %v2128_v18 = vadd.f32 %v2051_v6, %v529_v50 }
 0x338   :  { %v650_v23 = vsel %vm282_vm14, %v2128_v18, -inf }
 0x33b   :  { %999 = vrot.lane.b32.xlu1 %v1929_v58, %s1799_s26  ;;  %v573_v52 = vpop.f32.mrf.mxu3 }
 0x33d   :  { %v531_v53 = vpop.f32.mrf.mxu1 }
 0x346   :  { %1062 = vrot.lane.b32.xlu0 %v1931_v59, %s1799_s26 }
 0x349   :  { %v625_v55 = vpop.xlane.xlu2 %624 }
 0x34a   :  { %v667_v61 = vsub.f32 %v2026_v48, %v625_v55 }
 0x34c   :  { %v685_v63 = vmul.f32 1.442695, %v667_v61  ;;  %v984_v61 = vsel %vm814_vm15, %v2088_v54, 0 }
 0x34e   :  { %1083 = vrot.lane.b32.xlu0 %v1956_v9, %s1799_s26 }
 0x351   :  { %v622_v56 = vpop.xlane.xlu2 %621 }
 0x352   :  { %v666_v60 = vsub.f32 %v2033_v51, %v622_v56  ;;  %v2104_v51 = vadd.f32 %v2028_v49, %v487_v29 }
 0x354   :  { %v683_v62 = vmul.f32 1.442695, %v666_v60  ;;  %v644_v1 = vsel %vm282_vm14, %v2104_v51, -inf }
 0x356   :  { %1638 = vpow2.f32 %v683_v62 }
 0x357   :  { %1640 = vpow2.f32 %v685_v63 }
 0x359   :  { %v937_v58 = vpop.permute.xlu2 %936 }
 0x35a   :  { %v942_v0 = vsel %vm814_vm15, %v937_v58, 0 }
 0x35b   :  { %951 = vmatpush.bf16.msrb.mxu0 %v942_v0 }
 0x35c   :  { %v2097_v3 = vpop.eup %1638 }
 0x35d   :  { %v716_v59 = vsel %vm282_vm14, %v2097_v3, 0.0  ;;  %v2101_v9 = vpop.eup %1640 }
 0x35e   :  { %717 = vadd.xlane.f32.xlu2 %v716_v59  ;;  %v719_v5 = vsel %vm282_vm14, %v2101_v9, 0.0 }
 0x361   :  { %v958_v48 = vpop.permute.xlu2 %957 }
 0x362   :  { %v963_v4 = vsel %vm814_vm15, %v958_v48, 0 }
 0x363   :  { %972 = vmatpush.bf16.msrb.mxu1 %v963_v4 }
 0x365   :  { %720 = vadd.xlane.f32.xlu1 %v719_v5 }
 0x366   :  { %645 = vmax.xlane.f32.xlu2 %v644_v1 }
 0x36d   :  { %648 = vmax.xlane.f32.xlu1 %v647_v11 }
 0x375   :  { %v592_v2 = vpop.f32.mrf.mxu0  ;;  %657 = vmax.xlane.f32.xlu1 %v656_v16 }
 0x376   :  { %v2161_v45 = vadd.f32 %v2023_v47, %v592_v2 }
 0x378   :  { %633 = vmax.xlane.f32.xlu0 %v632_v17  ;;  %v659_v43 = vsel %vm282_vm14, %v2161_v45, -inf }
 0x37d   :  { %v594_v21 = vpop.f32.mrf.mxu0 }
 0x380   :  { %651 = vmax.xlane.f32.xlu0 %v650_v23 }
 0x385   :  { %v628_v24 = vpop.xlane.xlu1 %627 }
 0x386   :  { %v668_v49 = vsub.f32 %v2054_v15, %v628_v24  ;;  %v2145_v15 = vadd.f32 %v2008_v39, %v2080_v40 }
 0x388   :  { %v687_v57 = vmul.f32 1.442695, %v668_v49  ;;  %v653_v41 = vsel %vm282_vm14, %v2145_v15, -inf }
 0x38a   :  { %1642 = vpow2.f32 %v687_v57 }
 0x38d   :  { %v637_v25 = vpop.xlane.xlu1 %636  ;;  %v613_v31 = vpop.f32.mrf.mxu1 }
 0x38e   :  { %v671_v29 = vsub.f32 %v2063_v22, %v637_v25  ;;  %v2135_v32 = vadd.f32 %v2051_v6, %v613_v31  ;;  %v2149_v6 = vadd.f32 %v2008_v39, %v2067_v28 }
 0x390   :  { %v2137_v20 = vpop.eup %1642  ;;  %v693_v33 = vmul.f32 1.442695, %v671_v29  ;;  %v662_v35 = vsel %vm282_vm14, %v2135_v32, -inf  ;;  %v641_v40 = vsel %vm282_vm14, %v2149_v6, -inf }
 0x391   :  { %663 = vmax.xlane.f32.xlu2 %v662_v35  ;;  %v722_v36 = vsel %vm282_vm14, %v2137_v20, 0.0 }
 0x392   :  { %1644 = vpow2.f32 %v693_v33  ;;  %723 = vadd.xlane.f32.xlu0 %v722_v36 }
 0x395   :  { %v631_v22 = vpop.xlane.xlu1 %630  ;;  %v615_v37 = vpop.f32.mrf.mxu1 }
 0x396   :  { %v669_v34 = vsub.f32 %v2070_v19, %v631_v22 }
 0x398   :  { %v2151_v38 = vpop.eup %1644  ;;  %v689_v39 = vmul.f32 1.442695, %v669_v34 }
 0x399   :  { %654 = vmax.xlane.f32.xlu2 %v653_v41  ;;  %v731_v44 = vsel %vm282_vm14, %v2151_v38, 0.0 }
 0x39a   :  { %732 = vadd.xlane.f32.xlu1 %v731_v44  ;;  %642 = vmax.xlane.f32.xlu0 %v641_v40  ;;  %1646 = vpow2.f32 %v689_v39 }
 0x39c   :  { %v640_v28 = vpop.xlane.xlu0 %639 }
 0x39d   :  { %v672_v46 = vsub.f32 %v2075_v30, %v640_v28 }
 0x39f   :  { %v695_v19 = vmul.f32 1.442695, %v672_v46 }
 0x3a0   :  { %v2166_v52 = vpop.eup %1646 }
 0x3a1   :  { %1648 = vpow2.f32 %v695_v19  ;;  %v725_v47 = vsel %vm282_vm14, %v2166_v52, 0.0 }
 0x3a2   :  { %660 = vmax.xlane.f32.xlu0 %v659_v43 }
 0x3a5   :  { %v715_v50 = vpop.xlane.xlu0 %714 }
 0x3a6   :  { %1650 = vrcp.f32 %v715_v50 }
 0x3a7   :  { %v2168_v53 = vpop.eup %1648 }
 0x3a8   :  { %v734_v55 = vsel %vm282_vm14, %v2168_v53, 0.0 }
 0x3a9   :  { %735 = vadd.xlane.f32.xlu1 %v734_v55 }
 0x3aa   :  { %726 = vadd.xlane.f32.xlu0 %v725_v47 }
 0x3ac   :  { %v1651_v30 = vpop.eup %1650 }
 0x3ad   :  { %v777_v56 = vmul.f32 %v1651_v30, %v2082_v42  ;;  %v1000_v62 = vpop.permute.xlu1 %999 }
 0x3ae   :  { %v1005_v4 = vsel %vm814_vm15, %v1000_v62, 0 }
 0x3af   :  { %v793_v60 = vpack.c.bf16 %v777_v56, %v777_v56 }
 0x3b1   :  { %1020 = vrot.lane.b32.xlu2 %v1952_v7, %s1799_s26  ;;  %1511 = vmatmul.msk.bf16.vlgmr.msra.gmra.mxu2 %vm282_vm14, %v793_v60 }
 0x3b2   :  { %993 = vmatpush.bf16.msra.mxu2 %v984_v61 }
 0x3b8   :  { %v2180_v59 = vpop.permute.xlu0 %1062 }
 0x3c0   :  { %v2187_v16 = vpop.permute.xlu0 %1083 }
 0x3d1   :  { %v718_v63 = vpop.xlane.xlu2 %717 }
 0x3d2   :  { %1652 = vrcp.f32 %v718_v63 }
 0x3d8   :  { %v1653_v58 = vpop.eup %1652  ;;  %v721_v0 = vpop.xlane.xlu1 %720 }
 0x3d9   :  { %v778_v48 = vmul.f32 %v1653_v58, %v2097_v3  ;;  %1654 = vrcp.f32 %v721_v0  ;;  %v646_v24 = vpop.xlane.xlu2 %645 }
 0x3da   :  { %v674_v25 = vsub.f32 %v2104_v51, %v646_v24 }
 0x3db   :  { %v794_v42 = vpack.c.bf16 %v778_v48, %v778_v48 }
 0x3dd   :  { %1512 = vmatmul.msk.bf16.vlgmr.msra.gmra.mxu3 %vm282_vm14, %v794_v42 }
 0x3de   :  { %1014 = vmatpush.bf16.msra.mxu3 %v1005_v4 }
 0x3df   :  { %v1655_v7 = vpop.eup %1654 }
 0x3e0   :  { %v779_v54 = vmul.f32 %v1655_v7, %v2101_v9  ;;  %v649_v5 = vpop.xlane.xlu1 %648 }
 0x3e1   :  { %v675_v1 = vsub.f32 %v2112_v10, %v649_v5 }
 0x3e2   :  { %v795_v11 = vpack.c.bf16 %v779_v54, %v779_v54 }
 0x3e3   :  { %v701_v2 = vmul.f32 1.442695, %v675_v1 }
 0x3e4   :  { %1513 = vmatmul.msk.bf16.vlgmr.msra.gmra.mxu0 %vm282_vm14, %v795_v11 }
 0x3e5   :  { %1656 = vpow2.f32 %v701_v2 }
 0x3e8   :  { %v658_v33 = vpop.xlane.xlu1 %657 }
 0x3e9   :  { %v678_v35 = vsub.f32 %v2117_v12, %v658_v33 }
 0x3eb   :  { %v2190_v3 = vpop.eup %1656  ;;  %v634_v17 = vpop.xlane.xlu0 %633  ;;  %v707_v22 = vmul.f32 1.442695, %v678_v35 }
 0x3ec   :  { %v670_v21 = vsub.f32 %v2121_v13, %v634_v17  ;;  %v743_v23 = vsel %vm282_vm14, %v2190_v3, 0.0  ;;  %v699_v13 = vmul.f32 1.442695, %v674_v25 }
 0x3ed   :  { %744 = vadd.xlane.f32.xlu1 %v743_v23 }
 0x3ee   :  { %v691_v9 = vmul.f32 1.442695, %v670_v21  ;;  %v1068_v21 = vsel %vm814_vm15, %v2180_v59, 0 }
 0x3f0   :  { %1658 = vpow2.f32 %v691_v9 }
 0x3f3   :  { %v652_v10 = vpop.xlane.xlu0 %651 }
 0x3f4   :  { %v676_v49 = vsub.f32 %v2128_v18, %v652_v10 }
 0x3f6   :  { %v2196_v57 = vpop.eup %1658  ;;  %v703_v31 = vmul.f32 1.442695, %v676_v49 }
 0x3f7   :  { %v728_v29 = vsel %vm282_vm14, %v2196_v57, 0.0 }
 0x3f8   :  { %1660 = vpow2.f32 %v703_v31  ;;  %729 = vadd.xlane.f32.xlu0 %v728_v29 }
 0x3f9   :  { %1662 = vpow2.f32 %v699_v13 }
 0x3fa   :  { %1664 = vpow2.f32 %v707_v22  ;;  %v1089_v22 = vsel %vm814_vm15, %v2187_v16, 0 }
 0x3fe   :  { %v2202_v36 = vpop.eup %1660 }
 0x3ff   :  { %v746_v18 = vsel %vm282_vm14, %v2202_v36, 0.0  ;;  %v2206_v37 = vpop.eup %1662 }
 0x400   :  { %747 = vadd.xlane.f32.xlu0 %v746_v18  ;;  %v740_v41 = vsel %vm282_vm14, %v2206_v37, 0.0  ;;  %v2212_v12 = vpop.eup %1664 }
 0x401   :  { %v752_v47 = vsel %vm282_vm14, %v2212_v12, 0.0 }
 0x404   :  { %v2208_v51 = vpop.xlane.xlu2 %663 }
 0x405   :  { %v724_v34 = vpop.xlane.xlu0 %723 }
 0x406   :  { %1666 = vrcp.f32 %v724_v34 }
 0x408   :  { %741 = vadd.xlane.f32.xlu0 %v740_v41 }
 0x40c   :  { %v1667_v44 = vpop.eup %1666  ;;  %v655_v40 = vpop.xlane.xlu2 %654 }
 0x40d   :  { %v780_v39 = vmul.f32 %v1667_v44, %v2137_v20  ;;  %v677_v28 = vsub.f32 %v2145_v15, %v655_v40  ;;  %v733_v46 = vpop.xlane.xlu1 %732  ;;  %v643_v19 = vpop.xlane.xlu0 %642 }
 0x40e   :  { %1668 = vrcp.f32 %v733_v46  ;;  %v673_v43 = vsub.f32 %v2149_v6, %v643_v19 }
 0x40f   :  { %v796_v50 = vpack.c.bf16 %v780_v39, %v780_v39  ;;  %v705_v55 = vmul.f32 1.442695, %v677_v28 }
 0x410   :  { %v697_v30 = vmul.f32 1.442695, %v673_v43  ;;  %753 = vadd.xlane.f32.xlu0 %v752_v47 }
 0x411   :  { %1670 = vpow2.f32 %v705_v55  ;;  %1514 = vmatmul.msk.bf16.vlgmr.msra.gmra.mxu1 %vm282_vm14, %v796_v50 }
 0x412   :  { %1672 = vpow2.f32 %v697_v30 }
 0x414   :  { %v1669_v56 = vpop.eup %1668  ;;  %v1021_v20 = vpop.permute.xlu2 %1020 }
 0x415   :  { %v783_v15 = vmul.f32 %v1669_v56, %v2151_v38  ;;  %v1026_v60 = vsel %vm814_vm15, %v1021_v20, 0  ;;  %v661_v61 = vpop.xlane.xlu0 %660 }
 0x416   :  { %v679_v6 = vsub.f32 %v2161_v45, %v661_v61  ;;  %1035 = vmatpush.bf16.msra.mxu0 %v1026_v60 }
 0x417   :  { %v2223_v62 = vpop.eup %1670  ;;  %v799_v63 = vpack.c.bf16 %v783_v15, %v783_v15 }
 0x418   :  { %v2225_v58 = vpop.eup %1672  ;;  %v709_v0 = vmul.f32 1.442695, %v679_v6  ;;  %v749_v48 = vsel %vm282_vm14, %v2223_v62, 0.0 }
 0x419   :  { %750 = vadd.xlane.f32.xlu2 %v749_v48  ;;  %1517 = vmatmul.msk.bf16.vlgmr.msrb.gmra.mxu0 %vm282_vm14, %v799_v63  ;;  %v737_v38 = vsel %vm282_vm14, %v2225_v58, 0.0 }
 0x41a   :  { %1674 = vpow2.f32 %v709_v0  ;;  %738 = vadd.xlane.f32.xlu1 %v737_v38 }
 0x41c   :  { %v736_v42 = vpop.xlane.xlu1 %735 }
 0x41d   :  { %1676 = vrcp.f32 %v736_v42  ;;  %v727_v45 = vpop.xlane.xlu0 %726 }
 0x41e   :  { %1678 = vrcp.f32 %v727_v45 }
 0x420   :  { %v2232_v4 = vpop.eup %1674 }
 0x421   :  { %v755_v7 = vsel %vm282_vm14, %v2232_v4, 0.0 }
 0x422   :  { %756 = vadd.xlane.f32.xlu1 %v755_v7 }
 0x423   :  { %v1677_v54 = vpop.eup %1676 }
 0x424   :  { %v1679_v5 = vpop.eup %1678  ;;  %v784_v1 = vmul.f32 %v1677_v54, %v2168_v53  ;;  %1041 = vrot.lane.b32.xlu0 %v1954_v8, %s1799_s26  ;;  %v680_v8 = vsub.f32 %v2135_v32, %v2208_v51 }
 0x425   :  { %v781_v11 = vmul.f32 %v1679_v5, %v2166_v52 }
 0x426   :  { %v800_v2 = vpack.c.bf16 %v784_v1, %v784_v1  ;;  %v711_v53 = vmul.f32 1.442695, %v680_v8 }
 0x427   :  { %v797_v17 = vpack.c.bf16 %v781_v11, %v781_v11 }
 0x428   :  { %1518 = vmatmul.msk.bf16.vlgmr.msrb.gmra.mxu1 %vm282_vm14, %v800_v2  ;;  %1680 = vpow2.f32 %v711_v53 }
 0x429   :  { %1515 = vmatmul.msk.bf16.vlgmr.msrb.gmra.mxu2 %vm282_vm14, %v797_v17 }
 0x42a   :  { %1077 = vmatpush.bf16.msrb.mxu2 %v1068_v21 }
 0x42e   :  { %v2252_v9 = vpop.eup %1680 }
 0x42f   :  { %v758_v59 = vsel %vm282_vm14, %v2252_v9, 0.0 }
 0x431   :  { %1125 = vrot.lane.b32.xlu2 %v1982_v27, %s1799_s26 }
 0x434   :  { %v2246_v23 = vpop.f32.mrf.mxu2 }
 0x43b   :  { %1104 = vrot.lane.b32.xlu1 %v1980_v26, %s1799_s26 }
 0x43c   :  { %v829_v52 = vpop.f32.mrf.mxu2 }
 0x44e   :  { %759 = vadd.xlane.f32.xlu0 %v758_v59 }
 0x460   :  { %v2256_v24 = vpop.f32.mrf.mxu3  ;;  %v745_v27 = vpop.xlane.xlu1 %744 }
 0x461   :  { %1682 = vrcp.f32 %v745_v27  ;;  %v2258_v10 = vpop.f32.mrf.mxu0 }
 0x467   :  { %v1683_v49 = vpop.eup %1682 }
 0x468   :  { %v787_v26 = vmul.f32 %v1683_v49, %v2190_v3  ;;  %v850_v25 = vpop.f32.mrf.mxu3 }
 0x469   :  { %v871_v32 = vpop.f32.mrf.mxu0 }
 0x46a   :  { %v803_v31 = vpack.c.bf16 %v787_v26, %v787_v26 }
 0x46b   :  { %v730_v29 = vpop.xlane.xlu0 %729 }
 0x46c   :  { %1521 = vmatmul.msk.bf16.vlgmr.msra.gmra.mxu0 %vm282_vm14, %v803_v31  ;;  %1684 = vrcp.f32 %v730_v29 }
 0x472   :  { %v1685_v13 = vpop.eup %1684 }
 0x473   :  { %v782_v33 = vmul.f32 %v1685_v13, %v2196_v57  ;;  %v748_v35 = vpop.xlane.xlu0 %747 }
 0x475   :  { %v798_v18 = vpack.c.bf16 %v782_v33, %v782_v33 }
 0x477   :  { %1516 = vmatmul.msk.bf16.vlgmr.msrb.gmra.mxu3 %vm282_vm14, %v798_v18 }
 0x478   :  { %1098 = vmatpush.bf16.msrb.mxu3 %v1089_v22 }
 0x47b   :  { %v742_v51 = vpop.xlane.xlu0 %741 }
 0x47c   :  { %1686 = vrcp.f32 %v742_v51 }
 0x482   :  { %v1687_v3 = vpop.eup %1686 }
 0x483   :  { %v786_v34 = vmul.f32 %v1687_v3, %v2206_v37  ;;  %v754_v44 = vpop.xlane.xlu0 %753 }
 0x484   :  { %1688 = vrcp.f32 %v754_v44 }
 0x485   :  { %v802_v41 = vpack.c.bf16 %v786_v34, %v786_v34  ;;  %1690 = vrcp.f32 %v748_v35 }
 0x487   :  { %1520 = vmatmul.msk.bf16.vlgmr.msra.gmra.mxu3 %vm282_vm14, %v802_v41 }
 0x48a   :  { %v1689_v39 = vpop.eup %1688 }
 0x48b   :  { %v790_v16 = vmul.f32 %v1689_v39, %v2212_v12  ;;  %v1691_v46 = vpop.eup %1690 }
 0x48c   :  { %v751_v40 = vpop.xlane.xlu2 %750  ;;  %v788_v55 = vmul.f32 %v1691_v46, %v2202_v36 }
 0x48d   :  { %v739_v57 = vpop.xlane.xlu1 %738  ;;  %v806_v43 = vpack.c.bf16 %v790_v16, %v790_v16 }
 0x48e   :  { %1692 = vrcp.f32 %v739_v57  ;;  %v2268_v28 = vpop.f32.mrf.mxu1  ;;  %v804_v12 = vpack.c.bf16 %v788_v55, %v788_v55  ;;  %v1567_v57 = vld [vmem:[%s2407_s4] sm:$0xff] }
 0x48f   :  { %1694 = vrcp.f32 %v751_v40  ;;  %v1568_v40 = vld [vmem:[%s2407_s4 + $0x8] sm:$0xff] }
 0x494   :  { %v1693_v19 = vpop.eup %1692  ;;  %v1126_v37 = vpop.permute.xlu2 %1125 }
 0x495   :  { %v785_v50 = vmul.f32 %v1693_v19, %v2225_v58  ;;  %v1131_v60 = vsel %vm814_vm15, %v1126_v37, 0  ;;  %v1695_v36 = vpop.eup %1694  ;;  %v757_v6 = vpop.xlane.xlu1 %756 }
 0x496   :  { %v892_v47 = vpop.f32.mrf.mxu1  ;;  %v953_v30 = vpop.f32.mrf.mxu0  ;;  %v789_v63 = vmul.f32 %v1695_v36, %v2223_v62  ;;  %1696 = vrcp.f32 %v757_v6 }
 0x497   :  { %v801_v56 = vpack.c.bf16 %v785_v50, %v785_v50  ;;  %v1042_v20 = vpop.permute.xlu0 %1041  ;;  %1524 = vmatmul.msk.bf16.vlgmr.msrb.gmra.mxu3 %vm282_vm14, %v806_v43 }
 0x498   :  { %v1047_v15 = vsel %vm814_vm15, %v1042_v20, 0  ;;  %v805_v48 = vpack.c.bf16 %v789_v63, %v789_v63 }
 0x499   :  { %1519 = vmatmul.msk.bf16.vlgmr.msra.gmra.mxu2 %vm282_vm14, %v801_v56  ;;  %1056 = vmatpush.bf16.msra.mxu1 %v1047_v15 }
 0x49a   :  { %1239 = vmatpush.bf16.msra.mxu2 %v1568_v40 }
 0x49c   :  { %1522 = vmatmul.msk.bf16.vlgmr.msra.gmra.mxu1 %vm282_vm14, %v804_v12  ;;  %v1697_v38 = vpop.eup %1696 }
 0x49d   :  { %1140 = vmatpush.bf16.msrb.mxu1 %v1131_v60  ;;  %v791_v42 = vmul.f32 %v1697_v38, %v2232_v4 }
 0x49e   :  { %v955_v61 = vpop.f32.mrf.mxu0  ;;  %1240 = vmatpush.bf16.msra.mxu2 %v1567_v57 }
 0x49f   :  { %v807_v1 = vpack.c.bf16 %v791_v42, %v791_v42 }
 0x4a5   :  { %v974_v58 = vpop.f32.mrf.mxu1 }
 0x4a6   :  { %v1606_v0 = vpack.i.bf16 %v974_v58, %v953_v30 }
 0x4a9   :  { %1523 = vmatmul.msk.bf16.vlgmr.msrb.gmra.mxu2 %vm282_vm14, %v805_v48 }
 0x4ac   :  { %v911_v45 = vpop.f32.mrf.mxu2 }
 0x4ad   :  { %v1105_v7 = vpop.permute.xlu1 %1104  ;;  %v976_v54 = vpop.f32.mrf.mxu1 }
 0x4ae   :  { %v1110_v5 = vsel %vm814_vm15, %v1105_v7, 0  ;;  %vm1431_vm15 = vcmask 523264  }
 0x4af   :  { %1119 = vmatpush.bf16.msrb.mxu0 %v1110_v5 }
 0x4b2   :  { %1525 = vmatmul.msk.bf16.vlgmr.msrb.gmra.mxu0 %vm282_vm14, %v807_v1 }
 0x4b4   :  { %v913_v11 = vpop.f32.mrf.mxu2 }
 0x4c1   :  { %v760_v62 = vpop.xlane.xlu0 %759 }
 0x4c2   :  { %1698 = vrcp.f32 %v760_v62 }
 0x4c8   :  { %v1699_v2 = vpop.eup %1698 }
 0x4c9   :  { %v792_v17 = vmul.f32 %v1699_v2, %v2252_v9 }
 0x4cb   :  { %v808_v21 = vpack.c.bf16 %v792_v17, %v792_v17  ;;  %v1708_v17 = vld [vmem:[%s2403_s0] sm:$0xff] }
 0x4cd   :  { %1526 = vmatmul.msk.bf16.vlgmr.msrb.gmra.mxu1 %vm282_vm14, %v808_v21 }
 0x4e9   :  { %v1037_v8 = vpop.f32.mrf.mxu0 }
 0x4f1   :  { %v1039_v4 = vpop.f32.mrf.mxu0 }
 0x4fa   :  { %v932_v52 = vpop.f32.mrf.mxu3 }
 0x4fb   :  { %v1591_v53 = vpack.i.bf16 %v932_v52, %v911_v45 }
 0x4fd   :  { %1592 = vrot.lane.b32.xlu2 %v1591_v53, %s1800_s27  ;;  %v1709_v53 = vld [vmem:[%s2403_s0 + $0x8] sm:$0xff] }
 0x502   :  { %v934_v59 = vpop.f32.mrf.mxu3 }
 0x50a   :  { %v1016_v27 = vpop.f32.mrf.mxu3 }
 0x512   :  { %v1018_v49 = vpop.f32.mrf.mxu3 }
 0x519   :  { %v1058_v26 = vpop.f32.mrf.mxu1 }
 0x51a   :  { %v1100_v25 = vpop.f32.mrf.mxu3  ;;  %v1611_v51 = vpack.i.bf16 %v1058_v26, %v1037_v8 }
 0x51c   :  { %v995_v32 = vpop.f32.mrf.mxu2 }
 0x51d   :  { %v1596_v31 = vpack.i.bf16 %v1016_v27, %v995_v32 }
 0x51f   :  { %1597 = vrot.lane.b32.xlu1 %v1596_v31, %s1791_s9 }
 0x521   :  { %v1060_v9 = vpop.f32.mrf.mxu1 }
 0x522   :  { %v1102_v29 = vpop.f32.mrf.mxu3 }
 0x524   :  { %v997_v13 = vpop.f32.mrf.mxu2 }
 0x525   :  { %v1711_v13 = vld [vmem:[%s2403_s0 + $0x18] sm:$0xff] }
 0x527   :  { %1607 = vrot.lane.b32.xlu1 %v1606_v0, %s1800_s27 }
 0x52c   :  { %v1079_v33 = vpop.f32.mrf.mxu2 }
 0x52d   :  { %v1601_v35 = vpack.i.bf16 %v1100_v25, %v1079_v33  ;;  %v1710_v25 = vld [vmem:[%s2403_s0 + $0x10] sm:$0xff] }
 0x52f   :  { %v1121_v18 = vpop.f32.mrf.mxu0  ;;  %1602 = vrot.lane.b32.xlu2 %v1601_v35, %s1801_s28 }
 0x534   :  { %v1081_v22 = vpop.f32.mrf.mxu2 }
 0x537   :  { %v1123_v3 = vpop.f32.mrf.mxu0  ;;  %1612 = vrot.lane.b32.xlu2 %v1611_v51, %s1791_s9 }
 0x54a   :  { %v1142_v34 = vpop.f32.mrf.mxu1 }
 0x54b   :  { %v1616_v41 = vpack.i.bf16 %v1142_v34, %v1121_v18 }
 0x54d   :  { %1617 = vrot.lane.b32.xlu0 %v1616_v41, %s1801_s28  ;;  %s1471_s28 = sshll.u32 %s2410_s7, 4  ;;  %s1472_s28 = int_to_ptr.hbm [resolvable:$true] %s1471_s28 }
 0x552   :  { %v1144_v44 = vpop.f32.mrf.mxu1 }
 0x557   :  { %v1593_v39 = vpop.permute.xlu2 %1592 }
 0x558   :  { %v1595_v16 = vunpack.i.h.bf16 %v1593_v39  ;;  %v1594_v46 = vunpack.i.l.bf16 %v1593_v39 }
 0x55a   :  { %v1195_v55 = vsel %vm282_vm14, %v2256_v24, %v1595_v16  ;;  %v1194_v47 = vsel %vm282_vm14, %v2246_v23, %v1594_v46 }
 0x589   :  { %v1603_v19 = vpop.permute.xlu2 %1602 }
 0x58a   :  { %v1605_v30 = vunpack.i.h.bf16 %v1603_v19  ;;  %v1604_v56 = vunpack.i.l.bf16 %v1603_v19 }
 0x591   :  { %v1598_v43 = vpop.permute.xlu1 %1597  ;;  %v1613_v24 = vpop.permute.xlu2 %1612 }
 0x592   :  { %v1600_v50 = vunpack.i.h.bf16 %v1598_v43  ;;  %v1599_v37 = vunpack.i.l.bf16 %v1598_v43  ;;  %v1615_v0 = vunpack.i.h.bf16 %v1613_v24  ;;  %v1614_v48 = vunpack.i.l.bf16 %v1613_v24 }
 0x594   :  { %v1200_v20 = vsel %vm1198_vm1, %v1195_v55, %v1600_v50  ;;  %v1199_v15 = vsel %vm1198_vm1, %v1194_v47, %v1599_v37 }
 0x595   :  { %v1204_v60 = vsel %vm1203_vm2, %v1199_v15, %v1604_v56  ;;  %v1205_v12 = vsel %vm1203_vm2, %v1200_v20, %v1605_v30  ;;  %v1570_v20 = vld [vmem:[%s2408_s5 + $0x8] sm:$0xff]  ;;  %v1569_v15 = vld [vmem:[%s2408_s5] sm:$0xff] }
 0x596   :  { %v1208_v61 = vpack.c.bf16 %v1205_v12, %v1204_v60  ;;  %1379 = vmatpush.bf16.msra.mxu3 %v1570_v20 }
 0x598   :  { %1535 = vmatmul.msk.bf16.vlgmr.msra.gmra.mxu2 %vm63_vm0, %v1208_v61 }
 0x599   :  { %v1608_v36 = vpop.permute.xlu1 %1607 }
 0x59a   :  { %v1610_v6 = vunpack.i.h.bf16 %v1608_v36  ;;  %v1609_v63 = vunpack.i.l.bf16 %v1608_v36  ;;  %1380 = vmatpush.bf16.msra.mxu3 %v1569_v15 }
 0x59c   :  { %v1197_v23 = vsel %vm282_vm14, %v2268_v28, %v1610_v6  ;;  %v1196_v58 = vsel %vm282_vm14, %v2258_v10, %v1609_v63  ;;  %v2316_v10 = vld [vmem:[%s2409_s6] sm:$0x7] }
 0x59d   :  { %v1201_v7 = vsel %vm1198_vm1, %v1196_v58, %v1614_v48  ;;  %v1202_v54 = vsel %vm1198_vm1, %v1197_v23, %v1615_v0  ;;  %v1214_v28 = vperm.slane %v2316_v10, 0 }
 0x5bf   :  { %v1618_v38 = vpop.permute.xlu0 %1617 }
 0x5c0   :  { %v1620_v42 = vunpack.i.h.bf16 %v1618_v38  ;;  %v1619_v45 = vunpack.i.l.bf16 %v1618_v38 }
 0x5c2   :  { %v1206_v5 = vsel %vm1203_vm2, %v1201_v7, %v1619_v45  ;;  %v1207_v1 = vsel %vm1203_vm2, %v1202_v54, %v1620_v42 }
 0x5c3   :  { %v1209_v11 = vpack.c.bf16 %v1207_v1, %v1206_v5 }
 0x5c5   :  { %1536 = vmatmul.msk.bf16.gmra.mxu2 %vm63_vm0, %v1209_v11 }
 0x61b   :  { %v1242_v62 = vpop.f32.mrf.mxu2 }
 0x61c   :  { %v1243_v2 = vadd.f32 %v1242_v62, %v1214_v28 }
 0x61e   :  { %v2322_v21 = vadd.f32 %v1708_v17, %v1243_v2 }
 0x620   :  { %v1256_v8 = vsel %vm63_vm0, %v2322_v21, 0.0 }
 0x621   :  { %1257 = vadd.xlane.f32.xlu1 %v1256_v8 }
 0x623   :  { %v1244_v4 = vpop.f32.mrf.mxu2 }
 0x624   :  { %v1245_v52 = vadd.f32 %v1244_v4, %v1214_v28 }
 0x626   :  { %v2329_v59 = vadd.f32 %v1709_v53, %v1245_v52 }
 0x628   :  { %v1259_v27 = vsel %vm63_vm0, %v2329_v59, 0.0 }
 0x629   :  { %1260 = vadd.xlane.f32.xlu2 %v1259_v27 }
 0x648   :  { %v1247_v49 = vpop.f32.mrf.mxu2 }
 0x649   :  { %v1248_v26 = vadd.f32 %v1247_v49, %v1214_v28 }
 0x64b   :  { %v2336_v32 = vadd.f32 %v1710_v25, %v1248_v26 }
 0x64d   :  { %v1262_v31 = vsel %vm63_vm0, %v2336_v32, 0.0 }
 0x64e   :  { %1263 = vadd.xlane.f32.xlu0 %v1262_v31 }
 0x650   :  { %v1249_v9 = vpop.f32.mrf.mxu2 }
 0x651   :  { %v1250_v29 = vadd.f32 %v1249_v9, %v1214_v28 }
 0x653   :  { %v2343_v33 = vadd.f32 %v1711_v13, %v1250_v29 }
 0x655   :  { %v1265_v35 = vsel %vm63_vm0, %v2343_v33, 0.0 }
 0x656   :  { %1266 = vadd.xlane.f32.xlu1 %v1265_v35 }
 0x694   :  { %v1258_v18 = vpop.xlane.xlu1 %1257 }
 0x695   :  { %v1268_v22 = vmul.f32 %v1258_v18, %v1868_v14 }
 0x697   :  { %v1272_v51 = vsub.f32 %v2322_v21, %v1268_v22 }
 0x699   :  { %v1276_v3 = vmul.f32 %v1272_v51, %v1272_v51 }
 0x69b   :  { %v1280_v34 = vsel %vm63_vm0, %v1276_v3, 0.0 }
 0x69c   :  { %1281 = vadd.xlane.f32.xlu2 %v1280_v34  ;;  %v1261_v41 = vpop.xlane.xlu2 %1260 }
 0x69d   :  { %v1269_v44 = vmul.f32 %v1261_v41, %v1868_v14 }
 0x69f   :  { %v1273_v40 = vsub.f32 %v2329_v59, %v1269_v44 }
 0x6a1   :  { %v1277_v57 = vmul.f32 %v1273_v40, %v1273_v40 }
 0x6a3   :  { %v1283_v39 = vsel %vm63_vm0, %v1277_v57, 0.0 }
 0x6a4   :  { %1284 = vadd.xlane.f32.xlu1 %v1283_v39  ;;  %v1574_v39 = vld [vmem:[%s2407_s4 + $0x28] sm:$0xff] }
 0x6a5   :  { %1442 = vmatpush.bf16.msra.mxu0 %v1574_v39 }
 0x6c1   :  { %v1264_v16 = vpop.xlane.xlu0 %1263 }
 0x6c2   :  { %v1270_v46 = vmul.f32 %v1264_v16, %v1868_v14  ;;  %v1573_v16 = vld [vmem:[%s2407_s4 + $0x20] sm:$0xff] }
 0x6c3   :  { %1443 = vmatpush.bf16.msra.mxu0 %v1573_v16 }
 0x6c4   :  { %v2355_v19 = vsub.f32 %v2336_v32, %v1270_v46  ;;  %v1572_v46 = vld [vmem:[%s2407_s4 + $0x18] sm:$0xff] }
 0x6c6   :  { %v1278_v43 = vmul.f32 %v2355_v19, %v2355_v19 }
 0x6c7   :  { %1444 = vmatpush.bf16.msra.mxu0 %v1572_v46 }
 0x6c8   :  { %v1286_v50 = vsel %vm63_vm0, %v1278_v43, 0.0 }
 0x6c9   :  { %v1267_v37 = vpop.xlane.xlu1 %1266  ;;  %1287 = vadd.xlane.f32.xlu2 %v1286_v50  ;;  %v1354_v50 = vperm.slane %v2316_v10, 1 }
 0x6ca   :  { %v1271_v55 = vmul.f32 %v1267_v37, %v1868_v14 }
 0x6cc   :  { %v2362_v47 = vsub.f32 %v2343_v33, %v1271_v55 }
 0x6ce   :  { %v1279_v30 = vmul.f32 %v2362_v47, %v2362_v47 }
 0x6d0   :  { %v1289_v56 = vsel %vm63_vm0, %v1279_v30, 0.0 }
 0x6d1   :  { %1290 = vadd.xlane.f32.xlu1 %v1289_v56 }
 0x70f   :  { %v1282_v60 = vpop.xlane.xlu2 %1281 }
 0x710   :  { %v1292_v14 = vmul.f32 0.032258064, %v1282_v60 }
 0x712   :  { %v1296_v12 = vadd.f32 1e-06, %v1292_v14 }
 0x714   :  { %1700 = vrsqrt.f32 %v1296_v12  ;;  %vm1306_vm4 = vweird.f32 %v1296_v12 }
 0x717   :  { %v1285_v61 = vpop.xlane.xlu1 %1284 }
 0x718   :  { %v1293_v36 = vmul.f32 0.032258064, %v1285_v61 }
 0x71a   :  { %v1701_v6 = vpop.eup %1700  ;;  %v1297_v63 = vadd.f32 1e-06, %v1293_v36 }
 0x71b   :  { %v1301_v24 = vmul.f32 %v1701_v6, %v1296_v12  ;;  %vm1307_vm3 = vweird.f32 %v1701_v6 }
 0x71c   :  { %1702 = vrsqrt.f32 %v1297_v63  ;;  %vm1308_vm6 = vmor %vm1306_vm4, %vm1307_vm3  ;;  %vm1316_vm7 = vweird.f32 %v1297_v63 }
 0x71d   :  { %v1302_v23 = vmul.f32 %v1701_v6, %v1301_v24 }
 0x71f   :  { %v1303_v58 = vmul.f32 0.5, %v1302_v23 }
 0x721   :  { %v1304_v48 = vsub.f32 1.5, %v1303_v58 }
 0x722   :  { %v1703_v0 = vpop.eup %1702 }
 0x723   :  { %v1311_v38 = vmul.f32 %v1703_v0, %v1297_v63  ;;  %v1305_v45 = vmul.f32 %v1701_v6, %v1304_v48  ;;  %vm1317_vm5 = vweird.f32 %v1703_v0  ;;  %v1406_v63 = vperm.slane %v2316_v10, 2 }
 0x724   :  { %vm1318_vm8 = vmor %vm1316_vm7, %vm1317_vm5 }
 0x725   :  { %v1312_v42 = vmul.f32 %v1703_v0, %v1311_v38  ;;  %v1309_v5 = vsel %vm1308_vm6, %v1701_v6, %v1305_v45 }
 0x726   :  { %v1340_v28 = vmul.f32 %v1309_v5, %v1272_v51 }
 0x727   :  { %v1313_v7 = vmul.f32 0.5, %v1312_v42 }
 0x729   :  { %v1314_v54 = vsub.f32 1.5, %v1313_v7 }
 0x72b   :  { %v1315_v1 = vmul.f32 %v1703_v0, %v1314_v54 }
 0x72d   :  { %v1319_v11 = vsel %vm1318_vm8, %v1703_v0, %v1315_v1 }
 0x72e   :  { %v1341_v62 = vmul.f32 %v1319_v11, %v1273_v40 }
 0x730   :  { %v1348_v2 = vpack.c.bf16 %v1341_v62, %v1340_v28 }
 0x732   :  { %1545 = vmatmul.msk.bf16.vlgmr.msra.gmra.mxu3 %vm63_vm0, %v1348_v2 }
 0x73c   :  { %v1288_v17 = vpop.xlane.xlu2 %1287 }
 0x73d   :  { %v1294_v8 = vmul.f32 0.032258064, %v1288_v17 }
 0x73f   :  { %v1298_v4 = vadd.f32 1e-06, %v1294_v8 }
 0x741   :  { %1704 = vrsqrt.f32 %v1298_v4  ;;  %vm1326_vm10 = vweird.f32 %v1298_v4 }
 0x744   :  { %v1291_v52 = vpop.xlane.xlu1 %1290 }
 0x745   :  { %v1295_v53 = vmul.f32 0.032258064, %v1291_v52 }
 0x747   :  { %v1705_v27 = vpop.eup %1704  ;;  %v1299_v49 = vadd.f32 1e-06, %v1295_v53 }
 0x748   :  { %v1321_v26 = vmul.f32 %v1705_v27, %v1298_v4  ;;  %vm1327_vm9 = vweird.f32 %v1705_v27 }
 0x749   :  { %1706 = vrsqrt.f32 %v1299_v49  ;;  %vm1328_vm12 = vmor %vm1326_vm10, %vm1327_vm9  ;;  %vm1336_vm13 = vweird.f32 %v1299_v49 }
 0x74a   :  { %v1322_v25 = vmul.f32 %v1705_v27, %v1321_v26 }
 0x74c   :  { %v1323_v31 = vmul.f32 0.5, %v1322_v25 }
 0x74e   :  { %v1324_v29 = vsub.f32 1.5, %v1323_v31 }
 0x74f   :  { %v1707_v9 = vpop.eup %1706 }
 0x750   :  { %v1331_v13 = vmul.f32 %v1707_v9, %v1299_v49  ;;  %v1325_v18 = vmul.f32 %v1705_v27, %v1324_v29  ;;  %vm1337_vm11 = vweird.f32 %v1707_v9 }
 0x751   :  { %vm1338_vm14 = vmor %vm1336_vm13, %vm1337_vm11 }
 0x752   :  { %v1332_v35 = vmul.f32 %v1707_v9, %v1331_v13  ;;  %v1329_v34 = vsel %vm1328_vm12, %v1705_v27, %v1325_v18 }
 0x753   :  { %v1342_v44 = vmul.f32 %v1329_v34, %v2355_v19  ;;  %v1571_v19 = vld [vmem:[%s2407_s4 + $0x10] sm:$0xff] }
 0x754   :  { %v1333_v22 = vmul.f32 0.5, %v1332_v35  ;;  %1445 = vmatpush.bf16.msra.mxu0 %v1571_v19 }
 0x756   :  { %v1334_v51 = vsub.f32 1.5, %v1333_v22 }
 0x758   :  { %v1335_v3 = vmul.f32 %v1707_v9, %v1334_v51 }
 0x75a   :  { %v1339_v41 = vsel %vm1338_vm14, %v1707_v9, %v1335_v3 }
 0x75b   :  { %v1343_v40 = vmul.f32 %v1339_v41, %v2362_v47 }
 0x75d   :  { %v1349_v57 = vpack.c.bf16 %v1343_v40, %v1342_v44 }
 0x75f   :  { %1546 = vmatmul.msk.bf16.gmra.mxu3 %vm63_vm0, %v1349_v57 }
 0x7b5   :  { %v1382_v43 = vpop.f32.mrf.mxu3 }
 0x7b6   :  { %v1383_v37 = vadd.f32 %v1382_v43, %v1354_v50 }
 0x7b8   :  { %v1392_v30 = vmax.f32 %v1383_v37, 0.0 }
 0x7bd   :  { %v1384_v55 = vpop.f32.mrf.mxu3 }
 0x7be   :  { %v1385_v47 = vadd.f32 %v1384_v55, %v1354_v50 }
 0x7c0   :  { %v1393_v56 = vmax.f32 %v1385_v47, 0.0 }
 0x7c2   :  { %v1396_v20 = vpack.c.bf16 %v1393_v56, %v1392_v30 }
 0x7c4   :  { %1563 = vmatmul.msk.bf16.vlgmr.msra.gmra.mxu0 %vm1431_vm15, %v1396_v20 }
 0x7e2   :  { %v1387_v15 = vpop.f32.mrf.mxu3 }
 0x7e3   :  { %v1388_v60 = vadd.f32 %v1387_v15, %v1354_v50 }
 0x7e5   :  { %v1394_v61 = vmax.f32 %v1388_v60, 0.0 }
 0x7ea   :  { %v1389_v14 = vpop.f32.mrf.mxu3 }
 0x7eb   :  { %v1390_v12 = vadd.f32 %v1389_v14, %v1354_v50 }
 0x7ed   :  { %v1395_v36 = vmax.f32 %v1390_v12, 0.0 }
 0x7ef   :  { %v1397_v6 = vpack.c.bf16 %v1395_v36, %v1394_v61 }
 0x7f1   :  { %1564 = vmatmul.msk.bf16.gmra.mxu0 %vm1431_vm15, %v1397_v6 }
 0x841   :  { %v1447_v24 = vpop.f32.mrf.mxu0 }
 0x842   :  { %v1448_v23 = vadd.f32 %v1447_v24, %v1406_v63 }
 0x844   :  { %v1457_v58 = vadd.f32 %v1448_v23, %v2322_v21 }
 0x846   :  { %1461 = vst.msk [vmem:[#allocation7] sm:$0xff] %vm63_vm0, %v1457_v58 }
 0x849   :  { %v1449_v0 = vpop.f32.mrf.mxu0 }
 0x84a   :  { %v1450_v48 = vadd.f32 %v1449_v0, %v1406_v63 }
 0x84c   :  { %v1458_v38 = vadd.f32 %v1450_v48, %v2329_v59 }
 0x84e   :  { %1462 = vst.msk [vmem:[#allocation7 + $0x8] sm:$0xff] %vm63_vm0, %v1458_v38 }
 0x86e   :  { %v1452_v42 = vpop.f32.mrf.mxu0 }
 0x86f   :  { %v1453_v45 = vadd.f32 %v1452_v42, %v1406_v63 }
 0x871   :  { %v1459_v7 = vadd.f32 %v1453_v45, %v2336_v32 }
 0x873   :  { %1463 = vst.msk [vmem:[#allocation7 + $0x10] sm:$0xff] %vm63_vm0, %v1459_v7 }
 0x876   :  { %v1454_v10 = vpop.f32.mrf.mxu0 }
 0x877   :  { %v1455_v21 = vadd.f32 %v1454_v10, %v1406_v63 }
 0x879   :  { %v1460_v54 = vadd.f32 %v1455_v21, %v2343_v33 }
 0x87b   :  { %1464 = vst.msk [vmem:[#allocation7 + $0x18] sm:$0xff] %vm63_vm0, %v1460_v54 }
 0x87c   :  { %1477 = dma.vmem_to_hbm [thread:$0]  %s1470_s30, 512, %s1472_s28, [#allocation4], %s1803_s8, %s1803_s8, %s1800_s27  }
 0x87d   :  { %1788 = dma.done.wait [#allocation4], 512  }
 0x87e   :  { %1789 = vsyncadd [#allocation4], 4294966784 }
 0x87f   :  { %1482 = vsyncpa [#allocation3], 1 }
 0x880   :  { %1483 = vsyncpa [#allocation6], 1 }
 0x881   :  { %1484 = vsyncpa [#allocation4], 1 }

</bundles_post_ra>
